<compile_context>
chip_gen: v6e
topology: v6e:2x2x1
jax: 0.10.0
libtpu: 0.0.40
codegen_flags: <defaults>
</compile_context>

<pallas_src>
import functools
import numpy as np
import jax
import jax.numpy as jnp
from jax.experimental import pallas as pl
from jax.experimental.pallas import tpu as pltpu


# ---------------------------------------------------------------------------
# Fused kernel: 3x depthwise conv + ReLU + LN  ->  MHA  ->  out projection
# ---------------------------------------------------------------------------
def conv_attention_kernel(xp_ref, wc_ref, bc_ref, g_ref, bt_ref,
                          wqkv_ref, bqkv_ref, wo_ref, bo_ref, o_ref,
                          *, H, W, num_heads):
    C = wc_ref.shape[-1]
    S = H * W
    nh = num_heads
    hd = C // nh

    # ---- depthwise 3x3 conv: the three branches share every window load.
    wc = wc_ref[...]                                    # (3, 3, 3, C), tiny
    acc_q = jnp.zeros((H, W, C), jnp.float32)
    acc_k = jnp.zeros((H, W, C), jnp.float32)
    acc_v = jnp.zeros((H, W, C), jnp.float32)
    for dy in range(3):                                 # static 3x3 unroll
        for dx in range(3):
            win = xp_ref[0, dy:dy + H, dx:dx + W, :]    # (H, W, C), read once
            acc_q = acc_q + win * wc[0, dy, dx][None, None, :]
            acc_k = acc_k + win * wc[1, dy, dx][None, None, :]
            acc_v = acc_v + win * wc[2, dy, dx][None, None, :]

    # ---- bias + ReLU + LayerNorm over channels (f32 statistics).
    def relu_ln(a, n):
        a = jnp.maximum(a + bc_ref[n][None, None, :], 0.0).reshape(S, C)
        mean = jnp.mean(a, axis=-1, keepdims=True)
        var = jnp.mean((a - mean) ** 2, axis=-1, keepdims=True)
        a = (a - mean) * jax.lax.rsqrt(var + 1e-5)
        return a * g_ref[n][None, :] + bt_ref[n][None, :]        # (S, C) f32

    q_ln = relu_ln(acc_q, 0)
    k_ln = relu_ln(acc_k, 1)
    v_ln = relu_ln(acc_v, 2)

    # ---- full-width in-projections, bf16 in / f32 accumulate, channel-major
    #      output (C, S): the (S, C) activation is the transposed operand of
    #      the contraction, so no explicit transposes are needed anywhere.
    def in_proj(x_sc, n):
        y = jnp.einsum('cd,sd->cs', wqkv_ref[n], x_sc.astype(jnp.bfloat16),
                       preferred_element_type=jnp.float32)       # (C, S)
        return y + bqkv_ref[n]                                   # + (C, 1)

    qh = in_proj(q_ln, 0).reshape(nh, hd, S).astype(jnp.bfloat16)
    kh = in_proj(k_ln, 1).reshape(nh, hd, S).astype(jnp.bfloat16)
    vh = in_proj(v_ln, 2).reshape(nh, hd, S).astype(jnp.bfloat16)

    # ---- attention (1/sqrt(hd) already folded into q weights/bias).
    s = jnp.einsum('hdi,hdj->hij', qh, kh,
                   preferred_element_type=jnp.float32)           # (nh, S, S)
    m = jnp.max(s, axis=-1, keepdims=True)
    p = jnp.exp(s - m)
    denom = jnp.sum(p, axis=-1, keepdims=True)
    p = (p * pl.reciprocal(denom, approx=True)).astype(jnp.bfloat16)
    oh = jnp.einsum('hdj,hij->hdi', vh, p,
                    preferred_element_type=jnp.float32)          # (nh, hd, S)

    # ---- out-projection: (C, C) @ (C, S) -> (C, S), emitted directly in the
    #      output layout (S lane-dense) -> single plain store, no transpose.
    out = jnp.dot(wo_ref[...], oh.reshape(C, S).astype(jnp.bfloat16),
                  preferred_element_type=jnp.float32) + bo_ref[...]
    o_ref[0] = out
    # TODO(synk): attention/proj dropout omitted (p=0.0 / eval => identity).


def _conv_attention_call(xp, pk, *, B, C, H, W, num_heads):
    S = H * W
    Hp, Wp = H + 2, W + 2

    def const(shape):
        n = len(shape)
        return pl.BlockSpec(shape, lambda b, n=n: (0,) * n)

    kern = functools.partial(conv_attention_kernel, H=H, W=W,
                             num_heads=num_heads)
    return pl.pallas_call(
        kern,
        out_shape=jax.ShapeDtypeStruct((B, C, S), jnp.float32),
        grid=(B,),
        in_specs=[
            pl.BlockSpec((1, Hp, Wp, C), lambda b: (b, 0, 0, 0)),  # padded x
            const((3, 3, 3, C)),      # stacked depthwise conv weights (f32)
            const((3, C)),            # conv biases
            const((3, C)),            # LN gammas
            const((3, C)),            # LN betas
            const((3, C, C)),         # q/k/v in-proj weights (bf16, q scaled)
            const((3, C, 1)),         # q/k/v in-proj biases, channel-major
            const((C, C)),            # out-proj weight (bf16)
            const((C, 1)),            # out-proj bias, channel-major
        ],
        out_specs=pl.BlockSpec((1, C, S), lambda b: (b, 0, 0)),
        compiler_params=pltpu.CompilerParams(
            dimension_semantics=("parallel",)),   # batch across v7x TCs
    )(xp, pk["wc"], pk["bc"], pk["g"], pk["bt"],
      pk["wqkv"], pk["bqkv"], pk["wo"], pk["bo"])


# ---------------------------------------------------------------------------
# One-time parameter packing (hoisted out of the per-call path)
# ---------------------------------------------------------------------------
def pack_params(p, num_heads):
    C = p["out_w"].shape[0]
    hd = C // num_heads
    scale = 1.0 / float(np.sqrt(hd))

    wq, wk, wv = (p["in_proj_w"][:C], p["in_proj_w"][C:2 * C],
                  p["in_proj_w"][2 * C:])
    bq, bk, bv = (p["in_proj_b"][:C], p["in_proj_b"][C:2 * C],
                  p["in_proj_b"][2 * C:])

    return {
        "wc": jnp.stack([p["wq_conv"], p["wk_conv"], p["wv_conv"]]),  # (3,3,3,C)
        "bc": jnp.stack([p["bq_conv"], p["bk_conv"], p["bv_conv"]]),  # (3,C)
        "g": jnp.stack([p["gq"], p["gk"], p["gv"]]),                  # (3,C)
        "bt": jnp.stack([p["betaq"], p["betak"], p["betav"]]),        # (3,C)
        # Channel-major in-projection: Q'^T = Wq @ q^T, so the torch weight
        # slice is used as-is; 1/sqrt(hd) folded into the q weight + bias.
        "wqkv": jnp.stack([wq * scale, wk, wv]).astype(jnp.bfloat16), # (3,C,C)
        "bqkv": jnp.stack([bq * scale, bk, bv])[..., None],           # (3,C,1)
        "wo": p["out_w"].astype(jnp.bfloat16),                        # (C,C)
        "bo": p["out_b"][:, None],                                    # (C,1)
    }


@functools.partial(jax.jit, static_argnames=("num_heads",))
def conv_attention_forward(x_nchw, packed, *, num_heads):
    B, C, H, W = x_nchw.shape
    x = jnp.transpose(x_nchw, (0, 2, 3, 1))               # NCHW -> NHWC once
    xp = jnp.pad(x, ((0, 0), (1, 1), (1, 1), (0, 0)))     # shared 'same' pad
    out_cs = _conv_attention_call(xp, packed, B=B, C=C, H=H, W=W,
                                  num_heads=num_heads)    # (B, C, S)
    return out_cs.reshape(B, C, H, W)


# ---------------------------------------------------------------------------
# Pure-JAX reference (for correctness check)
# ---------------------------------------------------------------------------
def _ref_branch(x_nhwc, w, b, g, beta):
    H, W = x_nhwc.shape[1], x_nhwc.shape[2]
    xp = jnp.pad(x_nhwc, ((0, 0), (1, 1), (1, 1), (0, 0)))
    acc = jnp.zeros_like(x_nhwc)
    for dy in range(3):
        for dx in range(3):
            acc = acc + xp[:, dy:dy + H, dx:dx + W, :] * w[dy, dx]
    acc = jnp.maximum(acc + b, 0.0)
    mean = acc.mean(-1, keepdims=True)
    var = ((acc - mean) ** 2).mean(-1, keepdims=True)
    return (acc - mean) * jax.lax.rsqrt(var + 1e-5) * g + beta


def reference_forward(x_nchw, p, num_heads):
    B, C, H, W = x_nchw.shape
    S = H * W
    x = jnp.transpose(x_nchw, (0, 2, 3, 1))
    q = _ref_branch(x, p["wq_conv"], p["bq_conv"], p["gq"], p["betaq"]).reshape(B, S, C)
    k = _ref_branch(x, p["wk_conv"], p["bk_conv"], p["gk"], p["betak"]).reshape(B, S, C)
    v = _ref_branch(x, p["wv_conv"], p["bv_conv"], p["gv"], p["betav"]).reshape(B, S, C)
    wq, wk, wv = jnp.split(p["in_proj_w"], 3, axis=0)
    bq, bk, bv = jnp.split(p["in_proj_b"], 3)
    Q = q @ wq.T + bq
    K = k @ wk.T + bk
    V = v @ wv.T + bv
    hd = C // num_heads
    Qh = Q.reshape(B, S, num_heads, hd).transpose(0, 2, 1, 3)
    Kh = K.reshape(B, S, num_heads, hd).transpose(0, 2, 1, 3)
    Vh = V.reshape(B, S, num_heads, hd).transpose(0, 2, 1, 3)
    s = jnp.einsum("bhqd,bhkd->bhqk", Qh, Kh) / np.sqrt(hd)
    attn = jax.nn.softmax(s, axis=-1)
    oh = jnp.einsum("bhqk,bhkd->bhqd", attn, Vh)
    o = oh.transpose(0, 2, 1, 3).reshape(B, S, C)
    o = o @ p["out_w"].T + p["out_b"]
    return jnp.transpose(o, (0, 2, 1)).reshape(B, C, H, W)


# ---------------------------------------------------------------------------
if __name__ == "__main__":
    B, C, H, W = 2, 16, 8, 8
    num_heads = 2

    key = jax.random.PRNGKey(0)
    keys = jax.random.split(key, 18)

    def nrm(k_, shape, scale):
        return jax.random.normal(k_, shape, dtype=jnp.float32) * scale

    params = {
        # depthwise conv weights: PyTorch (C,1,3,3) stored here as (3,3,C)
        "wq_conv": nrm(keys[0], (3, 3, C), 0.2), "bq_conv": nrm(keys[1], (C,), 0.1),
        "wk_conv": nrm(keys[2], (3, 3, C), 0.2), "bk_conv": nrm(keys[3], (C,), 0.1),
        "wv_conv": nrm(keys[4], (3, 3, C), 0.2), "bv_conv": nrm(keys[5], (C,), 0.1),
        "gq": 1.0 + nrm(keys[11], (C,), 0.1), "betaq": nrm(keys[12], (C,), 0.1),
        "gk": 1.0 + nrm(keys[13], (C,), 0.1), "betak": nrm(keys[14], (C,), 0.1),
        "gv": 1.0 + nrm(keys[15], (C,), 0.1), "betav": nrm(keys[16], (C,), 0.1),
        # nn.MultiheadAttention parameters
        "in_proj_w": nrm(keys[6], (3 * C, C), 1.0 / np.sqrt(C)),
        "in_proj_b": nrm(keys[7], (3 * C,), 0.05),
        "out_w": nrm(keys[8], (C, C), 1.0 / np.sqrt(C)),
        "out_b": nrm(keys[9], (C,), 0.05),
    }

    x = jax.random.normal(keys[10], (B, C, H, W), dtype=jnp.float32)

    packed = pack_params(params, num_heads)          # one-time packing
    out = conv_attention_forward(x, packed, num_heads=num_heads)
    out = jax.block_until_ready(out)

    ref = jax.block_until_ready(reference_forward(x, params, num_heads))
    assert out.shape == (B, C, H, W), out.shape
    # bf16 MXU operands (f32 accumulation) => slightly looser tolerance.
    np.testing.assert_allclose(np.array(out), np.array(ref), rtol=3e-2, atol=3e-2)

    print("KERNEL_OK")
</pallas_src>

<mosaic_0001>
module attributes {stable_mosaic.version = 11 : i64} {
  func.func @conv_attention_kernel(%arg0: i32, %arg1: memref<1x10x10x16xf32, #tpu.memory_space<vmem>>, %arg2: memref<3x3x3x16xf32, #tpu.memory_space<vmem>>, %arg3: memref<3x16xf32, #tpu.memory_space<vmem>>, %arg4: memref<3x16xf32, #tpu.memory_space<vmem>>, %arg5: memref<3x16xf32, #tpu.memory_space<vmem>>, %arg6: memref<3x16x16xbf16, #tpu.memory_space<vmem>>, %arg7: memref<3x16x1xf32, #tpu.memory_space<vmem>>, %arg8: memref<16x16xbf16, #tpu.memory_space<vmem>>, %arg9: memref<16x1xf32, #tpu.memory_space<vmem>>, %arg10: memref<1x16x64xf32, #tpu.memory_space<vmem>>) attributes {dimension_semantics = [#tpu.dimension_semantics<parallel>], iteration_bounds = array<i64: 2>, scalar_prefetch = 0 : i64, scratch_operands = 0 : i64, tpu.core_type = #tpu.core_type<tc>, window_params = [{transform_indices = @transform_0, window_bounds = array<i64: 1, 10, 10, 16>}, {pipeline_mode = #tpu.pipeline_mode<synchronous>, transform_indices = @transform_1, window_bounds = array<i64: 3, 3, 3, 16>}, {pipeline_mode = #tpu.pipeline_mode<synchronous>, transform_indices = @transform_2, window_bounds = array<i64: 3, 16>}, {pipeline_mode = #tpu.pipeline_mode<synchronous>, transform_indices = @transform_3, window_bounds = array<i64: 3, 16>}, {pipeline_mode = #tpu.pipeline_mode<synchronous>, transform_indices = @transform_4, window_bounds = array<i64: 3, 16>}, {pipeline_mode = #tpu.pipeline_mode<synchronous>, transform_indices = @transform_5, window_bounds = array<i64: 3, 16, 16>}, {pipeline_mode = #tpu.pipeline_mode<synchronous>, transform_indices = @transform_6, window_bounds = array<i64: 3, 16, 1>}, {pipeline_mode = #tpu.pipeline_mode<synchronous>, transform_indices = @transform_7, window_bounds = array<i64: 16, 16>}, {pipeline_mode = #tpu.pipeline_mode<synchronous>, transform_indices = @transform_8, window_bounds = array<i64: 16, 1>}, {transform_indices = @transform_9, window_bounds = array<i64: 1, 16, 64>}]} {
    %c0 = arith.constant 0 : index
    %c0_0 = arith.constant 0 : index
    %c0_1 = arith.constant 0 : index
    %c0_2 = arith.constant 0 : index
    %0 = vector.load %arg2[%c0, %c0_0, %c0_1, %c0_2] : memref<3x3x3x16xf32, #tpu.memory_space<vmem>>, vector<3x3x3x16xf32>
    %cst = arith.constant 0.000000e+00 : f32
    %1 = vector.broadcast %cst : f32 to vector<8x8x16xf32>
    %cst_3 = arith.constant 0.000000e+00 : f32
    %2 = vector.broadcast %cst_3 : f32 to vector<8x8x16xf32>
    %cst_4 = arith.constant 0.000000e+00 : f32
    %3 = vector.broadcast %cst_4 : f32 to vector<8x8x16xf32>
    %c0_5 = arith.constant 0 : index
    %c0_6 = arith.constant 0 : index
    %c0_7 = arith.constant 0 : index
    %c0_8 = arith.constant 0 : index
    %4 = vector.load %arg1[%c0_5, %c0_6, %c0_7, %c0_8] : memref<1x10x10x16xf32, #tpu.memory_space<vmem>>, vector<1x8x8x16xf32>
    %5 = vector.shape_cast %4 : vector<1x8x8x16xf32> to vector<8x8x16xf32>
    %6 = vector.extract_strided_slice %0 {offsets = [0, 0, 0, 0], sizes = [1, 1, 1, 16], strides = [1, 1, 1, 1]} : vector<3x3x3x16xf32> to vector<1x1x1x16xf32>
    %7 = vector.shape_cast %6 : vector<1x1x1x16xf32> to vector<16xf32>
    %8 = vector.shape_cast %7 : vector<16xf32> to vector<1x1x16xf32>
    %9 = vector.broadcast %8 : vector<1x1x16xf32> to vector<8x8x16xf32>
    %10 = arith.mulf %5, %9 : vector<8x8x16xf32>
    %11 = arith.addf %1, %10 : vector<8x8x16xf32>
    %12 = vector.extract_strided_slice %0 {offsets = [1, 0, 0, 0], sizes = [1, 1, 1, 16], strides = [1, 1, 1, 1]} : vector<3x3x3x16xf32> to vector<1x1x1x16xf32>
    %13 = vector.shape_cast %12 : vector<1x1x1x16xf32> to vector<16xf32>
    %14 = vector.shape_cast %13 : vector<16xf32> to vector<1x1x16xf32>
    %15 = vector.broadcast %14 : vector<1x1x16xf32> to vector<8x8x16xf32>
    %16 = arith.mulf %5, %15 : vector<8x8x16xf32>
    %17 = arith.addf %2, %16 : vector<8x8x16xf32>
    %18 = vector.extract_strided_slice %0 {offsets = [2, 0, 0, 0], sizes = [1, 1, 1, 16], strides = [1, 1, 1, 1]} : vector<3x3x3x16xf32> to vector<1x1x1x16xf32>
    %19 = vector.shape_cast %18 : vector<1x1x1x16xf32> to vector<16xf32>
    %20 = vector.shape_cast %19 : vector<16xf32> to vector<1x1x16xf32>
    %21 = vector.broadcast %20 : vector<1x1x16xf32> to vector<8x8x16xf32>
    %22 = arith.mulf %5, %21 : vector<8x8x16xf32>
    %23 = arith.addf %3, %22 : vector<8x8x16xf32>
    %c0_9 = arith.constant 0 : index
    %c0_10 = arith.constant 0 : index
    %c1 = arith.constant 1 : index
    %c0_11 = arith.constant 0 : index
    %24 = vector.load %arg1[%c0_9, %c0_10, %c1, %c0_11] : memref<1x10x10x16xf32, #tpu.memory_space<vmem>>, vector<1x8x8x16xf32>
    %25 = vector.shape_cast %24 : vector<1x8x8x16xf32> to vector<8x8x16xf32>
    %26 = vector.extract_strided_slice %0 {offsets = [0, 0, 1, 0], sizes = [1, 1, 1, 16], strides = [1, 1, 1, 1]} : vector<3x3x3x16xf32> to vector<1x1x1x16xf32>
    %27 = vector.shape_cast %26 : vector<1x1x1x16xf32> to vector<16xf32>
    %28 = vector.shape_cast %27 : vector<16xf32> to vector<1x1x16xf32>
    %29 = vector.broadcast %28 : vector<1x1x16xf32> to vector<8x8x16xf32>
    %30 = arith.mulf %25, %29 : vector<8x8x16xf32>
    %31 = arith.addf %11, %30 : vector<8x8x16xf32>
    %32 = vector.extract_strided_slice %0 {offsets = [1, 0, 1, 0], sizes = [1, 1, 1, 16], strides = [1, 1, 1, 1]} : vector<3x3x3x16xf32> to vector<1x1x1x16xf32>
    %33 = vector.shape_cast %32 : vector<1x1x1x16xf32> to vector<16xf32>
    %34 = vector.shape_cast %33 : vector<16xf32> to vector<1x1x16xf32>
    %35 = vector.broadcast %34 : vector<1x1x16xf32> to vector<8x8x16xf32>
    %36 = arith.mulf %25, %35 : vector<8x8x16xf32>
    %37 = arith.addf %17, %36 : vector<8x8x16xf32>
    %38 = vector.extract_strided_slice %0 {offsets = [2, 0, 1, 0], sizes = [1, 1, 1, 16], strides = [1, 1, 1, 1]} : vector<3x3x3x16xf32> to vector<1x1x1x16xf32>
    %39 = vector.shape_cast %38 : vector<1x1x1x16xf32> to vector<16xf32>
    %40 = vector.shape_cast %39 : vector<16xf32> to vector<1x1x16xf32>
    %41 = vector.broadcast %40 : vector<1x1x16xf32> to vector<8x8x16xf32>
    %42 = arith.mulf %25, %41 : vector<8x8x16xf32>
    %43 = arith.addf %23, %42 : vector<8x8x16xf32>
    %c0_12 = arith.constant 0 : index
    %c0_13 = arith.constant 0 : index
    %c2 = arith.constant 2 : index
    %c0_14 = arith.constant 0 : index
    %44 = vector.load %arg1[%c0_12, %c0_13, %c2, %c0_14] : memref<1x10x10x16xf32, #tpu.memory_space<vmem>>, vector<1x8x8x16xf32>
    %45 = vector.shape_cast %44 : vector<1x8x8x16xf32> to vector<8x8x16xf32>
    %46 = vector.extract_strided_slice %0 {offsets = [0, 0, 2, 0], sizes = [1, 1, 1, 16], strides = [1, 1, 1, 1]} : vector<3x3x3x16xf32> to vector<1x1x1x16xf32>
    %47 = vector.shape_cast %46 : vector<1x1x1x16xf32> to vector<16xf32>
    %48 = vector.shape_cast %47 : vector<16xf32> to vector<1x1x16xf32>
    %49 = vector.broadcast %48 : vector<1x1x16xf32> to vector<8x8x16xf32>
    %50 = arith.mulf %45, %49 : vector<8x8x16xf32>
    %51 = arith.addf %31, %50 : vector<8x8x16xf32>
    %52 = vector.extract_strided_slice %0 {offsets = [1, 0, 2, 0], sizes = [1, 1, 1, 16], strides = [1, 1, 1, 1]} : vector<3x3x3x16xf32> to vector<1x1x1x16xf32>
    %53 = vector.shape_cast %52 : vector<1x1x1x16xf32> to vector<16xf32>
    %54 = vector.shape_cast %53 : vector<16xf32> to vector<1x1x16xf32>
    %55 = vector.broadcast %54 : vector<1x1x16xf32> to vector<8x8x16xf32>
    %56 = arith.mulf %45, %55 : vector<8x8x16xf32>
    %57 = arith.addf %37, %56 : vector<8x8x16xf32>
    %58 = vector.extract_strided_slice %0 {offsets = [2, 0, 2, 0], sizes = [1, 1, 1, 16], strides = [1, 1, 1, 1]} : vector<3x3x3x16xf32> to vector<1x1x1x16xf32>
    %59 = vector.shape_cast %58 : vector<1x1x1x16xf32> to vector<16xf32>
    %60 = vector.shape_cast %59 : vector<16xf32> to vector<1x1x16xf32>
    %61 = vector.broadcast %60 : vector<1x1x16xf32> to vector<8x8x16xf32>
    %62 = arith.mulf %45, %61 : vector<8x8x16xf32>
    %63 = arith.addf %43, %62 : vector<8x8x16xf32>
    %c0_15 = arith.constant 0 : index
    %c1_16 = arith.constant 1 : index
    %c0_17 = arith.constant 0 : index
    %c0_18 = arith.constant 0 : index
    %64 = vector.load %arg1[%c0_15, %c1_16, %c0_17, %c0_18] : memref<1x10x10x16xf32, #tpu.memory_space<vmem>>, vector<1x8x8x16xf32>
    %65 = vector.shape_cast %64 : vector<1x8x8x16xf32> to vector<8x8x16xf32>
    %66 = vector.extract_strided_slice %0 {offsets = [0, 1, 0, 0], sizes = [1, 1, 1, 16], strides = [1, 1, 1, 1]} : vector<3x3x3x16xf32> to vector<1x1x1x16xf32>
    %67 = vector.shape_cast %66 : vector<1x1x1x16xf32> to vector<16xf32>
    %68 = vector.shape_cast %67 : vector<16xf32> to vector<1x1x16xf32>
    %69 = vector.broadcast %68 : vector<1x1x16xf32> to vector<8x8x16xf32>
    %70 = arith.mulf %65, %69 : vector<8x8x16xf32>
    %71 = arith.addf %51, %70 : vector<8x8x16xf32>
    %72 = vector.extract_strided_slice %0 {offsets = [1, 1, 0, 0], sizes = [1, 1, 1, 16], strides = [1, 1, 1, 1]} : vector<3x3x3x16xf32> to vector<1x1x1x16xf32>
    %73 = vector.shape_cast %72 : vector<1x1x1x16xf32> to vector<16xf32>
    %74 = vector.shape_cast %73 : vector<16xf32> to vector<1x1x16xf32>
    %75 = vector.broadcast %74 : vector<1x1x16xf32> to vector<8x8x16xf32>
    %76 = arith.mulf %65, %75 : vector<8x8x16xf32>
    %77 = arith.addf %57, %76 : vector<8x8x16xf32>
    %78 = vector.extract_strided_slice %0 {offsets = [2, 1, 0, 0], sizes = [1, 1, 1, 16], strides = [1, 1, 1, 1]} : vector<3x3x3x16xf32> to vector<1x1x1x16xf32>
    %79 = vector.shape_cast %78 : vector<1x1x1x16xf32> to vector<16xf32>
    %80 = vector.shape_cast %79 : vector<16xf32> to vector<1x1x16xf32>
    %81 = vector.broadcast %80 : vector<1x1x16xf32> to vector<8x8x16xf32>
    %82 = arith.mulf %65, %81 : vector<8x8x16xf32>
    %83 = arith.addf %63, %82 : vector<8x8x16xf32>
    %c0_19 = arith.constant 0 : index
    %c1_20 = arith.constant 1 : index
    %c1_21 = arith.constant 1 : index
    %c0_22 = arith.constant 0 : index
    %84 = vector.load %arg1[%c0_19, %c1_20, %c1_21, %c0_22] : memref<1x10x10x16xf32, #tpu.memory_space<vmem>>, vector<1x8x8x16xf32>
    %85 = vector.shape_cast %84 : vector<1x8x8x16xf32> to vector<8x8x16xf32>
    %86 = vector.extract_strided_slice %0 {offsets = [0, 1, 1, 0], sizes = [1, 1, 1, 16], strides = [1, 1, 1, 1]} : vector<3x3x3x16xf32> to vector<1x1x1x16xf32>
    %87 = vector.shape_cast %86 : vector<1x1x1x16xf32> to vector<16xf32>
    %88 = vector.shape_cast %87 : vector<16xf32> to vector<1x1x16xf32>
    %89 = vector.broadcast %88 : vector<1x1x16xf32> to vector<8x8x16xf32>
    %90 = arith.mulf %85, %89 : vector<8x8x16xf32>
    %91 = arith.addf %71, %90 : vector<8x8x16xf32>
    %92 = vector.extract_strided_slice %0 {offsets = [1, 1, 1, 0], sizes = [1, 1, 1, 16], strides = [1, 1, 1, 1]} : vector<3x3x3x16xf32> to vector<1x1x1x16xf32>
    %93 = vector.shape_cast %92 : vector<1x1x1x16xf32> to vector<16xf32>
    %94 = vector.shape_cast %93 : vector<16xf32> to vector<1x1x16xf32>
    %95 = vector.broadcast %94 : vector<1x1x16xf32> to vector<8x8x16xf32>
    %96 = arith.mulf %85, %95 : vector<8x8x16xf32>
    %97 = arith.addf %77, %96 : vector<8x8x16xf32>
    %98 = vector.extract_strided_slice %0 {offsets = [2, 1, 1, 0], sizes = [1, 1, 1, 16], strides = [1, 1, 1, 1]} : vector<3x3x3x16xf32> to vector<1x1x1x16xf32>
    %99 = vector.shape_cast %98 : vector<1x1x1x16xf32> to vector<16xf32>
    %100 = vector.shape_cast %99 : vector<16xf32> to vector<1x1x16xf32>
    %101 = vector.broadcast %100 : vector<1x1x16xf32> to vector<8x8x16xf32>
    %102 = arith.mulf %85, %101 : vector<8x8x16xf32>
    %103 = arith.addf %83, %102 : vector<8x8x16xf32>
    %c0_23 = arith.constant 0 : index
    %c1_24 = arith.constant 1 : index
    %c2_25 = arith.constant 2 : index
    %c0_26 = arith.constant 0 : index
    %104 = vector.load %arg1[%c0_23, %c1_24, %c2_25, %c0_26] : memref<1x10x10x16xf32, #tpu.memory_space<vmem>>, vector<1x8x8x16xf32>
    %105 = vector.shape_cast %104 : vector<1x8x8x16xf32> to vector<8x8x16xf32>
    %106 = vector.extract_strided_slice %0 {offsets = [0, 1, 2, 0], sizes = [1, 1, 1, 16], strides = [1, 1, 1, 1]} : vector<3x3x3x16xf32> to vector<1x1x1x16xf32>
    %107 = vector.shape_cast %106 : vector<1x1x1x16xf32> to vector<16xf32>
    %108 = vector.shape_cast %107 : vector<16xf32> to vector<1x1x16xf32>
    %109 = vector.broadcast %108 : vector<1x1x16xf32> to vector<8x8x16xf32>
    %110 = arith.mulf %105, %109 : vector<8x8x16xf32>
    %111 = arith.addf %91, %110 : vector<8x8x16xf32>
    %112 = vector.extract_strided_slice %0 {offsets = [1, 1, 2, 0], sizes = [1, 1, 1, 16], strides = [1, 1, 1, 1]} : vector<3x3x3x16xf32> to vector<1x1x1x16xf32>
    %113 = vector.shape_cast %112 : vector<1x1x1x16xf32> to vector<16xf32>
    %114 = vector.shape_cast %113 : vector<16xf32> to vector<1x1x16xf32>
    %115 = vector.broadcast %114 : vector<1x1x16xf32> to vector<8x8x16xf32>
    %116 = arith.mulf %105, %115 : vector<8x8x16xf32>
    %117 = arith.addf %97, %116 : vector<8x8x16xf32>
    %118 = vector.extract_strided_slice %0 {offsets = [2, 1, 2, 0], sizes = [1, 1, 1, 16], strides = [1, 1, 1, 1]} : vector<3x3x3x16xf32> to vector<1x1x1x16xf32>
    %119 = vector.shape_cast %118 : vector<1x1x1x16xf32> to vector<16xf32>
    %120 = vector.shape_cast %119 : vector<16xf32> to vector<1x1x16xf32>
    %121 = vector.broadcast %120 : vector<1x1x16xf32> to vector<8x8x16xf32>
    %122 = arith.mulf %105, %121 : vector<8x8x16xf32>
    %123 = arith.addf %103, %122 : vector<8x8x16xf32>
    %c0_27 = arith.constant 0 : index
    %c2_28 = arith.constant 2 : index
    %c0_29 = arith.constant 0 : index
    %c0_30 = arith.constant 0 : index
    %124 = vector.load %arg1[%c0_27, %c2_28, %c0_29, %c0_30] : memref<1x10x10x16xf32, #tpu.memory_space<vmem>>, vector<1x8x8x16xf32>
    %125 = vector.shape_cast %124 : vector<1x8x8x16xf32> to vector<8x8x16xf32>
    %126 = vector.extract_strided_slice %0 {offsets = [0, 2, 0, 0], sizes = [1, 1, 1, 16], strides = [1, 1, 1, 1]} : vector<3x3x3x16xf32> to vector<1x1x1x16xf32>
    %127 = vector.shape_cast %126 : vector<1x1x1x16xf32> to vector<16xf32>
    %128 = vector.shape_cast %127 : vector<16xf32> to vector<1x1x16xf32>
    %129 = vector.broadcast %128 : vector<1x1x16xf32> to vector<8x8x16xf32>
    %130 = arith.mulf %125, %129 : vector<8x8x16xf32>
    %131 = arith.addf %111, %130 : vector<8x8x16xf32>
    %132 = vector.extract_strided_slice %0 {offsets = [1, 2, 0, 0], sizes = [1, 1, 1, 16], strides = [1, 1, 1, 1]} : vector<3x3x3x16xf32> to vector<1x1x1x16xf32>
    %133 = vector.shape_cast %132 : vector<1x1x1x16xf32> to vector<16xf32>
    %134 = vector.shape_cast %133 : vector<16xf32> to vector<1x1x16xf32>
    %135 = vector.broadcast %134 : vector<1x1x16xf32> to vector<8x8x16xf32>
    %136 = arith.mulf %125, %135 : vector<8x8x16xf32>
    %137 = arith.addf %117, %136 : vector<8x8x16xf32>
    %138 = vector.extract_strided_slice %0 {offsets = [2, 2, 0, 0], sizes = [1, 1, 1, 16], strides = [1, 1, 1, 1]} : vector<3x3x3x16xf32> to vector<1x1x1x16xf32>
    %139 = vector.shape_cast %138 : vector<1x1x1x16xf32> to vector<16xf32>
    %140 = vector.shape_cast %139 : vector<16xf32> to vector<1x1x16xf32>
    %141 = vector.broadcast %140 : vector<1x1x16xf32> to vector<8x8x16xf32>
    %142 = arith.mulf %125, %141 : vector<8x8x16xf32>
    %143 = arith.addf %123, %142 : vector<8x8x16xf32>
    %c0_31 = arith.constant 0 : index
    %c2_32 = arith.constant 2 : index
    %c1_33 = arith.constant 1 : index
    %c0_34 = arith.constant 0 : index
    %144 = vector.load %arg1[%c0_31, %c2_32, %c1_33, %c0_34] : memref<1x10x10x16xf32, #tpu.memory_space<vmem>>, vector<1x8x8x16xf32>
    %145 = vector.shape_cast %144 : vector<1x8x8x16xf32> to vector<8x8x16xf32>
    %146 = vector.extract_strided_slice %0 {offsets = [0, 2, 1, 0], sizes = [1, 1, 1, 16], strides = [1, 1, 1, 1]} : vector<3x3x3x16xf32> to vector<1x1x1x16xf32>
    %147 = vector.shape_cast %146 : vector<1x1x1x16xf32> to vector<16xf32>
    %148 = vector.shape_cast %147 : vector<16xf32> to vector<1x1x16xf32>
    %149 = vector.broadcast %148 : vector<1x1x16xf32> to vector<8x8x16xf32>
    %150 = arith.mulf %145, %149 : vector<8x8x16xf32>
    %151 = arith.addf %131, %150 : vector<8x8x16xf32>
    %152 = vector.extract_strided_slice %0 {offsets = [1, 2, 1, 0], sizes = [1, 1, 1, 16], strides = [1, 1, 1, 1]} : vector<3x3x3x16xf32> to vector<1x1x1x16xf32>
    %153 = vector.shape_cast %152 : vector<1x1x1x16xf32> to vector<16xf32>
    %154 = vector.shape_cast %153 : vector<16xf32> to vector<1x1x16xf32>
    %155 = vector.broadcast %154 : vector<1x1x16xf32> to vector<8x8x16xf32>
    %156 = arith.mulf %145, %155 : vector<8x8x16xf32>
    %157 = arith.addf %137, %156 : vector<8x8x16xf32>
    %158 = vector.extract_strided_slice %0 {offsets = [2, 2, 1, 0], sizes = [1, 1, 1, 16], strides = [1, 1, 1, 1]} : vector<3x3x3x16xf32> to vector<1x1x1x16xf32>
    %159 = vector.shape_cast %158 : vector<1x1x1x16xf32> to vector<16xf32>
    %160 = vector.shape_cast %159 : vector<16xf32> to vector<1x1x16xf32>
    %161 = vector.broadcast %160 : vector<1x1x16xf32> to vector<8x8x16xf32>
    %162 = arith.mulf %145, %161 : vector<8x8x16xf32>
    %163 = arith.addf %143, %162 : vector<8x8x16xf32>
    %c0_35 = arith.constant 0 : index
    %c2_36 = arith.constant 2 : index
    %c2_37 = arith.constant 2 : index
    %c0_38 = arith.constant 0 : index
    %164 = vector.load %arg1[%c0_35, %c2_36, %c2_37, %c0_38] : memref<1x10x10x16xf32, #tpu.memory_space<vmem>>, vector<1x8x8x16xf32>
    %165 = vector.shape_cast %164 : vector<1x8x8x16xf32> to vector<8x8x16xf32>
    %166 = vector.extract_strided_slice %0 {offsets = [0, 2, 2, 0], sizes = [1, 1, 1, 16], strides = [1, 1, 1, 1]} : vector<3x3x3x16xf32> to vector<1x1x1x16xf32>
    %167 = vector.shape_cast %166 : vector<1x1x1x16xf32> to vector<16xf32>
    %168 = vector.shape_cast %167 : vector<16xf32> to vector<1x1x16xf32>
    %169 = vector.broadcast %168 : vector<1x1x16xf32> to vector<8x8x16xf32>
    %170 = arith.mulf %165, %169 : vector<8x8x16xf32>
    %171 = arith.addf %151, %170 : vector<8x8x16xf32>
    %172 = vector.extract_strided_slice %0 {offsets = [1, 2, 2, 0], sizes = [1, 1, 1, 16], strides = [1, 1, 1, 1]} : vector<3x3x3x16xf32> to vector<1x1x1x16xf32>
    %173 = vector.shape_cast %172 : vector<1x1x1x16xf32> to vector<16xf32>
    %174 = vector.shape_cast %173 : vector<16xf32> to vector<1x1x16xf32>
    %175 = vector.broadcast %174 : vector<1x1x16xf32> to vector<8x8x16xf32>
    %176 = arith.mulf %165, %175 : vector<8x8x16xf32>
    %177 = arith.addf %157, %176 : vector<8x8x16xf32>
    %178 = vector.extract_strided_slice %0 {offsets = [2, 2, 2, 0], sizes = [1, 1, 1, 16], strides = [1, 1, 1, 1]} : vector<3x3x3x16xf32> to vector<1x1x1x16xf32>
    %179 = vector.shape_cast %178 : vector<1x1x1x16xf32> to vector<16xf32>
    %180 = vector.shape_cast %179 : vector<16xf32> to vector<1x1x16xf32>
    %181 = vector.broadcast %180 : vector<1x1x16xf32> to vector<8x8x16xf32>
    %182 = arith.mulf %165, %181 : vector<8x8x16xf32>
    %183 = arith.addf %163, %182 : vector<8x8x16xf32>
    %c0_39 = arith.constant 0 : index
    %c0_40 = arith.constant 0 : index
    %184 = vector.load %arg3[%c0_39, %c0_40] : memref<3x16xf32, #tpu.memory_space<vmem>>, vector<1x16xf32>
    %185 = vector.shape_cast %184 : vector<1x16xf32> to vector<16xf32>
    %186 = vector.shape_cast %185 : vector<16xf32> to vector<1x1x16xf32>
    %187 = vector.broadcast %186 : vector<1x1x16xf32> to vector<8x8x16xf32>
    %188 = arith.addf %171, %187 : vector<8x8x16xf32>
    %cst_41 = arith.constant 0.000000e+00 : f32
    %189 = vector.broadcast %cst_41 : f32 to vector<8x8x16xf32>
    %190 = arith.maximumf %188, %189 : vector<8x8x16xf32>
    %191 = vector.shape_cast %190 : vector<8x8x16xf32> to vector<64x16xf32>
    %cst_42 = arith.constant dense<0.000000e+00> : vector<64xf32>
    %192 = vector.multi_reduction <add>, %191, %cst_42 [1] : vector<64x16xf32> to vector<64xf32>
    %193 = vector.shape_cast %192 : vector<64xf32> to vector<64x1xf32>
    %cst_43 = arith.constant 1.600000e+01 : f32
    %194 = vector.broadcast %cst_43 : f32 to vector<64x1xf32>
    %195 = arith.divf %193, %194 : vector<64x1xf32>
    %196 = vector.broadcast %195 : vector<64x1xf32> to vector<64x16xf32>
    %197 = arith.subf %191, %196 : vector<64x16xf32>
    %198 = arith.mulf %197, %197 : vector<64x16xf32>
    %cst_44 = arith.constant dense<0.000000e+00> : vector<64xf32>
    %199 = vector.multi_reduction <add>, %198, %cst_44 [1] : vector<64x16xf32> to vector<64xf32>
    %200 = vector.shape_cast %199 : vector<64xf32> to vector<64x1xf32>
    %cst_45 = arith.constant 1.600000e+01 : f32
    %201 = vector.broadcast %cst_45 : f32 to vector<64x1xf32>
    %202 = arith.divf %200, %201 : vector<64x1xf32>
    %203 = vector.broadcast %195 : vector<64x1xf32> to vector<64x16xf32>
    %204 = arith.subf %191, %203 : vector<64x16xf32>
    %cst_46 = arith.constant 9.99999974E-6 : f32
    %205 = vector.broadcast %cst_46 : f32 to vector<64x1xf32>
    %206 = arith.addf %202, %205 : vector<64x1xf32>
    %207 = math.rsqrt %206 : vector<64x1xf32>
    %208 = vector.broadcast %207 : vector<64x1xf32> to vector<64x16xf32>
    %209 = arith.mulf %204, %208 : vector<64x16xf32>
    %c0_47 = arith.constant 0 : index
    %c0_48 = arith.constant 0 : index
    %210 = vector.load %arg4[%c0_47, %c0_48] : memref<3x16xf32, #tpu.memory_space<vmem>>, vector<1x16xf32>
    %211 = vector.shape_cast %210 : vector<1x16xf32> to vector<16xf32>
    %212 = vector.shape_cast %211 : vector<16xf32> to vector<1x16xf32>
    %213 = vector.broadcast %212 : vector<1x16xf32> to vector<64x16xf32>
    %214 = arith.mulf %209, %213 : vector<64x16xf32>
    %c0_49 = arith.constant 0 : index
    %c0_50 = arith.constant 0 : index
    %215 = vector.load %arg5[%c0_49, %c0_50] : memref<3x16xf32, #tpu.memory_space<vmem>>, vector<1x16xf32>
    %216 = vector.shape_cast %215 : vector<1x16xf32> to vector<16xf32>
    %217 = vector.shape_cast %216 : vector<16xf32> to vector<1x16xf32>
    %218 = vector.broadcast %217 : vector<1x16xf32> to vector<64x16xf32>
    %219 = arith.addf %214, %218 : vector<64x16xf32>
    %c1_51 = arith.constant 1 : index
    %c0_52 = arith.constant 0 : index
    %220 = vector.load %arg3[%c1_51, %c0_52] : memref<3x16xf32, #tpu.memory_space<vmem>>, vector<1x16xf32>
    %221 = vector.shape_cast %220 : vector<1x16xf32> to vector<16xf32>
    %222 = vector.shape_cast %221 : vector<16xf32> to vector<1x1x16xf32>
    %223 = vector.broadcast %222 : vector<1x1x16xf32> to vector<8x8x16xf32>
    %224 = arith.addf %177, %223 : vector<8x8x16xf32>
    %cst_53 = arith.constant 0.000000e+00 : f32
    %225 = vector.broadcast %cst_53 : f32 to vector<8x8x16xf32>
    %226 = arith.maximumf %224, %225 : vector<8x8x16xf32>
    %227 = vector.shape_cast %226 : vector<8x8x16xf32> to vector<64x16xf32>
    %cst_54 = arith.constant dense<0.000000e+00> : vector<64xf32>
    %228 = vector.multi_reduction <add>, %227, %cst_54 [1] : vector<64x16xf32> to vector<64xf32>
    %229 = vector.shape_cast %228 : vector<64xf32> to vector<64x1xf32>
    %cst_55 = arith.constant 1.600000e+01 : f32
    %230 = vector.broadcast %cst_55 : f32 to vector<64x1xf32>
    %231 = arith.divf %229, %230 : vector<64x1xf32>
    %232 = vector.broadcast %231 : vector<64x1xf32> to vector<64x16xf32>
    %233 = arith.subf %227, %232 : vector<64x16xf32>
    %234 = arith.mulf %233, %233 : vector<64x16xf32>
    %cst_56 = arith.constant dense<0.000000e+00> : vector<64xf32>
    %235 = vector.multi_reduction <add>, %234, %cst_56 [1] : vector<64x16xf32> to vector<64xf32>
    %236 = vector.shape_cast %235 : vector<64xf32> to vector<64x1xf32>
    %cst_57 = arith.constant 1.600000e+01 : f32
    %237 = vector.broadcast %cst_57 : f32 to vector<64x1xf32>
    %238 = arith.divf %236, %237 : vector<64x1xf32>
    %239 = vector.broadcast %231 : vector<64x1xf32> to vector<64x16xf32>
    %240 = arith.subf %227, %239 : vector<64x16xf32>
    %cst_58 = arith.constant 9.99999974E-6 : f32
    %241 = vector.broadcast %cst_58 : f32 to vector<64x1xf32>
    %242 = arith.addf %238, %241 : vector<64x1xf32>
    %243 = math.rsqrt %242 : vector<64x1xf32>
    %244 = vector.broadcast %243 : vector<64x1xf32> to vector<64x16xf32>
    %245 = arith.mulf %240, %244 : vector<64x16xf32>
    %c1_59 = arith.constant 1 : index
    %c0_60 = arith.constant 0 : index
    %246 = vector.load %arg4[%c1_59, %c0_60] : memref<3x16xf32, #tpu.memory_space<vmem>>, vector<1x16xf32>
    %247 = vector.shape_cast %246 : vector<1x16xf32> to vector<16xf32>
    %248 = vector.shape_cast %247 : vector<16xf32> to vector<1x16xf32>
    %249 = vector.broadcast %248 : vector<1x16xf32> to vector<64x16xf32>
    %250 = arith.mulf %245, %249 : vector<64x16xf32>
    %c1_61 = arith.constant 1 : index
    %c0_62 = arith.constant 0 : index
    %251 = vector.load %arg5[%c1_61, %c0_62] : memref<3x16xf32, #tpu.memory_space<vmem>>, vector<1x16xf32>
    %252 = vector.shape_cast %251 : vector<1x16xf32> to vector<16xf32>
    %253 = vector.shape_cast %252 : vector<16xf32> to vector<1x16xf32>
    %254 = vector.broadcast %253 : vector<1x16xf32> to vector<64x16xf32>
    %255 = arith.addf %250, %254 : vector<64x16xf32>
    %c2_63 = arith.constant 2 : index
    %c0_64 = arith.constant 0 : index
    %256 = vector.load %arg3[%c2_63, %c0_64] : memref<3x16xf32, #tpu.memory_space<vmem>>, vector<1x16xf32>
    %257 = vector.shape_cast %256 : vector<1x16xf32> to vector<16xf32>
    %258 = vector.shape_cast %257 : vector<16xf32> to vector<1x1x16xf32>
    %259 = vector.broadcast %258 : vector<1x1x16xf32> to vector<8x8x16xf32>
    %260 = arith.addf %183, %259 : vector<8x8x16xf32>
    %cst_65 = arith.constant 0.000000e+00 : f32
    %261 = vector.broadcast %cst_65 : f32 to vector<8x8x16xf32>
    %262 = arith.maximumf %260, %261 : vector<8x8x16xf32>
    %263 = vector.shape_cast %262 : vector<8x8x16xf32> to vector<64x16xf32>
    %cst_66 = arith.constant dense<0.000000e+00> : vector<64xf32>
    %264 = vector.multi_reduction <add>, %263, %cst_66 [1] : vector<64x16xf32> to vector<64xf32>
    %265 = vector.shape_cast %264 : vector<64xf32> to vector<64x1xf32>
    %cst_67 = arith.constant 1.600000e+01 : f32
    %266 = vector.broadcast %cst_67 : f32 to vector<64x1xf32>
    %267 = arith.divf %265, %266 : vector<64x1xf32>
    %268 = vector.broadcast %267 : vector<64x1xf32> to vector<64x16xf32>
    %269 = arith.subf %263, %268 : vector<64x16xf32>
    %270 = arith.mulf %269, %269 : vector<64x16xf32>
    %cst_68 = arith.constant dense<0.000000e+00> : vector<64xf32>
    %271 = vector.multi_reduction <add>, %270, %cst_68 [1] : vector<64x16xf32> to vector<64xf32>
    %272 = vector.shape_cast %271 : vector<64xf32> to vector<64x1xf32>
    %cst_69 = arith.constant 1.600000e+01 : f32
    %273 = vector.broadcast %cst_69 : f32 to vector<64x1xf32>
    %274 = arith.divf %272, %273 : vector<64x1xf32>
    %275 = vector.broadcast %267 : vector<64x1xf32> to vector<64x16xf32>
    %276 = arith.subf %263, %275 : vector<64x16xf32>
    %cst_70 = arith.constant 9.99999974E-6 : f32
    %277 = vector.broadcast %cst_70 : f32 to vector<64x1xf32>
    %278 = arith.addf %274, %277 : vector<64x1xf32>
    %279 = math.rsqrt %278 : vector<64x1xf32>
    %280 = vector.broadcast %279 : vector<64x1xf32> to vector<64x16xf32>
    %281 = arith.mulf %276, %280 : vector<64x16xf32>
    %c2_71 = arith.constant 2 : index
    %c0_72 = arith.constant 0 : index
    %282 = vector.load %arg4[%c2_71, %c0_72] : memref<3x16xf32, #tpu.memory_space<vmem>>, vector<1x16xf32>
    %283 = vector.shape_cast %282 : vector<1x16xf32> to vector<16xf32>
    %284 = vector.shape_cast %283 : vector<16xf32> to vector<1x16xf32>
    %285 = vector.broadcast %284 : vector<1x16xf32> to vector<64x16xf32>
    %286 = arith.mulf %281, %285 : vector<64x16xf32>
    %c2_73 = arith.constant 2 : index
    %c0_74 = arith.constant 0 : index
    %287 = vector.load %arg5[%c2_73, %c0_74] : memref<3x16xf32, #tpu.memory_space<vmem>>, vector<1x16xf32>
    %288 = vector.shape_cast %287 : vector<1x16xf32> to vector<16xf32>
    %289 = vector.shape_cast %288 : vector<16xf32> to vector<1x16xf32>
    %290 = vector.broadcast %289 : vector<1x16xf32> to vector<64x16xf32>
    %291 = arith.addf %286, %290 : vector<64x16xf32>
    %c0_75 = arith.constant 0 : index
    %c0_76 = arith.constant 0 : index
    %c0_77 = arith.constant 0 : index
    %292 = vector.load %arg6[%c0_75, %c0_76, %c0_77] : memref<3x16x16xbf16, #tpu.memory_space<vmem>>, vector<1x16x16xbf16>
    %293 = vector.shape_cast %292 : vector<1x16x16xbf16> to vector<16x16xbf16>
    %294 = arith.truncf %219 : vector<64x16xf32> to vector<64x16xbf16>
    "tpu.trace_start"() <{level = 10 : i32, message = "cd,sd->cs"}> : () -> ()
    %cst_78 = arith.constant dense<0.000000e+00> : vector<16x64xf32>
    %295 = tpu.matmul %293, %294, %cst_78 {dimension_numbers = #tpu.dot_dimension_numbers<[1], [1], [0], [0], [0, 0, 1, 0], [], []>} : vector<16x16xbf16>, vector<64x16xbf16>, vector<16x64xf32> -> vector<16x64xf32>
    "tpu.trace_stop"() : () -> ()
    %c0_79 = arith.constant 0 : index
    %c0_80 = arith.constant 0 : index
    %c0_81 = arith.constant 0 : index
    %296 = vector.load %arg7[%c0_79, %c0_80, %c0_81] : memref<3x16x1xf32, #tpu.memory_space<vmem>>, vector<1x16x1xf32>
    %297 = vector.shape_cast %296 : vector<1x16x1xf32> to vector<16x1xf32>
    %298 = vector.broadcast %297 : vector<16x1xf32> to vector<16x64xf32>
    %299 = arith.addf %295, %298 : vector<16x64xf32>
    %300 = vector.shape_cast %299 : vector<16x64xf32> to vector<2x8x64xf32>
    %301 = arith.truncf %300 : vector<2x8x64xf32> to vector<2x8x64xbf16>
    %c1_82 = arith.constant 1 : index
    %c0_83 = arith.constant 0 : index
    %c0_84 = arith.constant 0 : index
    %302 = vector.load %arg6[%c1_82, %c0_83, %c0_84] : memref<3x16x16xbf16, #tpu.memory_space<vmem>>, vector<1x16x16xbf16>
    %303 = vector.shape_cast %302 : vector<1x16x16xbf16> to vector<16x16xbf16>
    %304 = arith.truncf %255 : vector<64x16xf32> to vector<64x16xbf16>
    "tpu.trace_start"() <{level = 10 : i32, message = "cd,sd->cs"}> : () -> ()
    %cst_85 = arith.constant dense<0.000000e+00> : vector<16x64xf32>
    %305 = tpu.matmul %303, %304, %cst_85 {dimension_numbers = #tpu.dot_dimension_numbers<[1], [1], [0], [0], [0, 0, 1, 0], [], []>} : vector<16x16xbf16>, vector<64x16xbf16>, vector<16x64xf32> -> vector<16x64xf32>
    "tpu.trace_stop"() : () -> ()
    %c1_86 = arith.constant 1 : index
    %c0_87 = arith.constant 0 : index
    %c0_88 = arith.constant 0 : index
    %306 = vector.load %arg7[%c1_86, %c0_87, %c0_88] : memref<3x16x1xf32, #tpu.memory_space<vmem>>, vector<1x16x1xf32>
    %307 = vector.shape_cast %306 : vector<1x16x1xf32> to vector<16x1xf32>
    %308 = vector.broadcast %307 : vector<16x1xf32> to vector<16x64xf32>
    %309 = arith.addf %305, %308 : vector<16x64xf32>
    %310 = vector.shape_cast %309 : vector<16x64xf32> to vector<2x8x64xf32>
    %311 = arith.truncf %310 : vector<2x8x64xf32> to vector<2x8x64xbf16>
    %c2_89 = arith.constant 2 : index
    %c0_90 = arith.constant 0 : index
    %c0_91 = arith.constant 0 : index
    %312 = vector.load %arg6[%c2_89, %c0_90, %c0_91] : memref<3x16x16xbf16, #tpu.memory_space<vmem>>, vector<1x16x16xbf16>
    %313 = vector.shape_cast %312 : vector<1x16x16xbf16> to vector<16x16xbf16>
    %314 = arith.truncf %291 : vector<64x16xf32> to vector<64x16xbf16>
    "tpu.trace_start"() <{level = 10 : i32, message = "cd,sd->cs"}> : () -> ()
    %cst_92 = arith.constant dense<0.000000e+00> : vector<16x64xf32>
    %315 = tpu.matmul %313, %314, %cst_92 {dimension_numbers = #tpu.dot_dimension_numbers<[1], [1], [0], [0], [0, 0, 1, 0], [], []>} : vector<16x16xbf16>, vector<64x16xbf16>, vector<16x64xf32> -> vector<16x64xf32>
    "tpu.trace_stop"() : () -> ()
    %c2_93 = arith.constant 2 : index
    %c0_94 = arith.constant 0 : index
    %c0_95 = arith.constant 0 : index
    %316 = vector.load %arg7[%c2_93, %c0_94, %c0_95] : memref<3x16x1xf32, #tpu.memory_space<vmem>>, vector<1x16x1xf32>
    %317 = vector.shape_cast %316 : vector<1x16x1xf32> to vector<16x1xf32>
    %318 = vector.broadcast %317 : vector<16x1xf32> to vector<16x64xf32>
    %319 = arith.addf %315, %318 : vector<16x64xf32>
    %320 = vector.shape_cast %319 : vector<16x64xf32> to vector<2x8x64xf32>
    %321 = arith.truncf %320 : vector<2x8x64xf32> to vector<2x8x64xbf16>
    "tpu.trace_start"() <{level = 10 : i32, message = "hdi,hdj->hij"}> : () -> ()
    %cst_96 = arith.constant dense<0.000000e+00> : vector<2x64x64xf32>
    %322 = tpu.matmul %301, %311, %cst_96 {dimension_numbers = #tpu.dot_dimension_numbers<[1], [1], [2], [2], [0, 0, 0, 2, 1, 2], [0], [0]>} : vector<2x8x64xbf16>, vector<2x8x64xbf16>, vector<2x64x64xf32> -> vector<2x64x64xf32>
    "tpu.trace_stop"() : () -> ()
    %cst_97 = arith.constant dense<0xFF800000> : vector<2x64xf32>
    %323 = vector.multi_reduction <maximumf>, %322, %cst_97 [2] : vector<2x64x64xf32> to vector<2x64xf32>
    %324 = vector.shape_cast %323 : vector<2x64xf32> to vector<2x64x1xf32>
    %325 = vector.broadcast %324 : vector<2x64x1xf32> to vector<2x64x64xf32>
    %326 = arith.subf %322, %325 : vector<2x64x64xf32>
    %327 = math.exp %326 : vector<2x64x64xf32>
    %cst_98 = arith.constant dense<0.000000e+00> : vector<2x64xf32>
    %328 = vector.multi_reduction <add>, %327, %cst_98 [2] : vector<2x64x64xf32> to vector<2x64xf32>
    %329 = vector.shape_cast %328 : vector<2x64xf32> to vector<2x64x1xf32>
    %330 = tpu.reciprocal %329 {approx = true} : vector<2x64x1xf32> -> vector<2x64x1xf32>
    %331 = vector.broadcast %330 : vector<2x64x1xf32> to vector<2x64x64xf32>
    %332 = arith.mulf %327, %331 : vector<2x64x64xf32>
    %333 = arith.truncf %332 : vector<2x64x64xf32> to vector<2x64x64xbf16>
    "tpu.trace_start"() <{level = 10 : i32, message = "hdj,hij->hdi"}> : () -> ()
    %cst_99 = arith.constant dense<0.000000e+00> : vector<2x8x64xf32>
    %334 = tpu.matmul %321, %333, %cst_99 {dimension_numbers = #tpu.dot_dimension_numbers<[2], [2], [1], [1], [0, 0, 0, 1, 1, 1], [0], [0]>} : vector<2x8x64xbf16>, vector<2x64x64xbf16>, vector<2x8x64xf32> -> vector<2x8x64xf32>
    "tpu.trace_stop"() : () -> ()
    %c0_100 = arith.constant 0 : index
    %c0_101 = arith.constant 0 : index
    %335 = vector.load %arg8[%c0_100, %c0_101] : memref<16x16xbf16, #tpu.memory_space<vmem>>, vector<16x16xbf16>
    %336 = vector.shape_cast %334 : vector<2x8x64xf32> to vector<16x64xf32>
    %337 = arith.truncf %336 : vector<16x64xf32> to vector<16x64xbf16>
    %cst_102 = arith.constant dense<0.000000e+00> : vector<16x64xf32>
    %338 = tpu.matmul %335, %337, %cst_102 {dimension_numbers = #tpu.dot_dimension_numbers<[1], [0], [0], [1], [0, 0, 1, 1], [], []>} : vector<16x16xbf16>, vector<16x64xbf16>, vector<16x64xf32> -> vector<16x64xf32>
    %c0_103 = arith.constant 0 : index
    %c0_104 = arith.constant 0 : index
    %339 = vector.load %arg9[%c0_103, %c0_104] : memref<16x1xf32, #tpu.memory_space<vmem>>, vector<16x1xf32>
    %340 = vector.broadcast %339 : vector<16x1xf32> to vector<16x64xf32>
    %341 = arith.addf %338, %340 : vector<16x64xf32>
    %c0_105 = arith.constant 0 : index
    %c0_106 = arith.constant 0 : index
    %c0_107 = arith.constant 0 : index
    %342 = vector.load %arg10[%c0_105, %c0_106, %c0_107] : memref<1x16x64xf32, #tpu.memory_space<vmem>>, vector<1x16x64xf32>
    %343 = vector.shape_cast %342 : vector<1x16x64xf32> to vector<16x64xf32>
    %344 = vector.shape_cast %341 : vector<16x64xf32> to vector<1x16x64xf32>
    tpu.vector_store %arg10[%c0_105, %c0_106, %c0_107], %344 {strides = array<i32>} : memref<1x16x64xf32, #tpu.memory_space<vmem>>, vector<1x16x64xf32>,
    return
  }
  func.func @transform_0(%arg0: i32) -> (i32, i32, i32, i32) {
    %c0_i32 = arith.constant 0 : i32
    %c0_i32_0 = arith.constant 0 : i32
    %c0_i32_1 = arith.constant 0 : i32
    %c0_i32_2 = arith.constant 0 : i32
    return %arg0, %c0_i32, %c0_i32_0, %c0_i32_1 : i32, i32, i32, i32
  }
  func.func @transform_1(%arg0: i32) -> (i32, i32, i32, i32) {
    %c0_i32 = arith.constant 0 : i32
    %c0_i32_0 = arith.constant 0 : i32
    %c0_i32_1 = arith.constant 0 : i32
    %c0_i32_2 = arith.constant 0 : i32
    %c0_i32_3 = arith.constant 0 : i32
    return %c0_i32, %c0_i32_0, %c0_i32_1, %c0_i32_2 : i32, i32, i32, i32
  }
  func.func @transform_2(%arg0: i32) -> (i32, i32) {
    %c0_i32 = arith.constant 0 : i32
    %c0_i32_0 = arith.constant 0 : i32
    %c0_i32_1 = arith.constant 0 : i32
    return %c0_i32, %c0_i32_0 : i32, i32
  }
  func.func @transform_3(%arg0: i32) -> (i32, i32) {
    %c0_i32 = arith.constant 0 : i32
    %c0_i32_0 = arith.constant 0 : i32
    %c0_i32_1 = arith.constant 0 : i32
    return %c0_i32, %c0_i32_0 : i32, i32
  }
  func.func @transform_4(%arg0: i32) -> (i32, i32) {
    %c0_i32 = arith.constant 0 : i32
    %c0_i32_0 = arith.constant 0 : i32
    %c0_i32_1 = arith.constant 0 : i32
    return %c0_i32, %c0_i32_0 : i32, i32
  }
  func.func @transform_5(%arg0: i32) -> (i32, i32, i32) {
    %c0_i32 = arith.constant 0 : i32
    %c0_i32_0 = arith.constant 0 : i32
    %c0_i32_1 = arith.constant 0 : i32
    %c0_i32_2 = arith.constant 0 : i32
    return %c0_i32, %c0_i32_0, %c0_i32_1 : i32, i32, i32
  }
  func.func @transform_6(%arg0: i32) -> (i32, i32, i32) {
    %c0_i32 = arith.constant 0 : i32
    %c0_i32_0 = arith.constant 0 : i32
    %c0_i32_1 = arith.constant 0 : i32
    %c0_i32_2 = arith.constant 0 : i32
    return %c0_i32, %c0_i32_0, %c0_i32_1 : i32, i32, i32
  }
  func.func @transform_7(%arg0: i32) -> (i32, i32) {
    %c0_i32 = arith.constant 0 : i32
    %c0_i32_0 = arith.constant 0 : i32
    %c0_i32_1 = arith.constant 0 : i32
    return %c0_i32, %c0_i32_0 : i32, i32
  }
  func.func @transform_8(%arg0: i32) -> (i32, i32) {
    %c0_i32 = arith.constant 0 : i32
    %c0_i32_0 = arith.constant 0 : i32
    %c0_i32_1 = arith.constant 0 : i32
    return %c0_i32, %c0_i32_0 : i32, i32
  }
  func.func @transform_9(%arg0: i32) -> (i32, i32, i32) {
    %c0_i32 = arith.constant 0 : i32
    %c0_i32_0 = arith.constant 0 : i32
    %c0_i32_1 = arith.constant 0 : i32
    return %arg0, %c0_i32, %c0_i32_0 : i32, i32, i32
  }
}

</mosaic_0001>

<bundles_post_ra>
// kernel: conv_attention_forward.1
= control target key start
LH: loop header
LB: loop body
LE: loop exit
PB: predicated region body
PF: predicated region fallthrough
CT: control target
= control target key end

     0   :  { %s2709_s30 = smov 0   ;;  %s4110_s0 = inlined_call_operand.vmem [shape: f32[2,10,10,16], index: 0, kind: input, shape index: {}]   ;;  %s4111_s1 = inlined_call_operand.vmem [shape: f32[3,3,3,16], index: 1, kind: input, shape index: {}]   ;;  %s4112_s2 = inlined_call_operand.vmem [shape: f32[3,16], index: 2, kind: input, shape index: {}]   ;;  %s4113_s3 = inlined_call_operand.vmem [shape: f32[3,16], index: 3, kind: input, shape index: {}]   ;;  %s4114_s4 = inlined_call_operand.vmem [shape: f32[3,16], index: 4, kind: input, shape index: {}]   ;;  %s4115_s5 = inlined_call_operand.vmem [shape: bf16[3,16,16], index: 5, kind: input, shape index: {}]   ;;  %s4116_s6 = inlined_call_operand.vmem [shape: f32[3,16,1], index: 6, kind: input, shape index: {}]   ;;  %s4117_s7 = inlined_call_operand.vmem [shape: bf16[16,16], index: 7, kind: input, shape index: {}]   ;;  %s4118_s8 = inlined_call_operand.vmem [shape: f32[16,1], index: 8, kind: input, shape index: {}]   ;;  %s4119_s9 = inlined_call_operand.vmem [shape: f32[2,16,64], index: 9, kind: output, shape index: {}]  }
   0x1 LB: > { %s2269_s10 = sadd.s32 4294967295, %s2654_s30   ;;  %p2273_p0 = scmp.ge.s32.totalorder %s2654_s30, 1  ;;  %s2654_s30 = sphi %s2709_s30, %s19_s30  }
   0x2   : > { %p287_p1 = scmp.lt.s32.totalorder %s2654_s30, 3 }
   0x4   : > { %p288_p2 = pnand %p2273_p0, %p287_p1 }
   0x6   : > { %291 = sbr.rel (%p288_p2) target bundleno = 1663 (0x67f), region = 56 }
   0xb   : > { %p323_p3 = scmp.lt.s32.totalorder %s2269_s10, 1  ;;  %v351_v0 = vlaneseq  ;;  %v334_v1 = vld [vmem:[%s4111_s1] sm:$0x7]  ;;  %v335_v2 = vld [vmem:[%s4111_s1 + $0x4] sm:$0x7]  ;;  %vm978_vm0 = vcmask 130048  }
   0xc   : > { %v336_v4 = vld [vmem:[%s4111_s1 + $0x8] sm:$0x7]  ;;  %vm2657_vm1 = vmmov 0   ;;  %vm1688_vm2 = vcmask 1043456   ;;  %vm1675_vm3 = vcmask 64512   ;;  %vm1853_vm4 = vcmask 523264  }
   0xd   : > { %s4166_s10 = smov (!%p323_p3, %s2269_s10), 1  ;;  %v352_v3 = vshrl.u32 %v351_v0, 7 }
   0xe   : > { %s2488_s17 = smul.u32 160, %s4166_s10  ;;  %s2362_s19 = sshll.u32 %s4166_s10, 4 }
   0xf   : > { %v2729_v5 = vsub.s32 0, %v352_v3  ;;  %v2731_v6 = vsub.s32 1, %v352_v3  ;;  %v2733_v7 = vsub.s32 2, %v352_v3 }
  0x10   : > { %s2738_s20 = scalar_lea.vmem %s4110_s0, %s2488_s17 }
  0x11   : > { %4140 = vst [vmem:[#allocation2_spill] sm:$0xff] %v2729_v5  ;;  %4141 = vst [vmem:[#allocation3_spill] sm:$0xff] %v2731_v6  ;;  %v2741_v8 = vrot.slane %v334_v1, %v2729_v5  ;;  %v2744_v9 = vrot.slane %v334_v1, %v2731_v6  ;;  %v2747_v10 = vrot.slane %v334_v1, %v2733_v7  ;;  %v2753_v12 = vld [vmem:[%s2738_s20 + $0x60] sm:$0xff]  ;;  %v2780_v22 = vld [vmem:[%s2738_s20 + $0x70] sm:$0xff] }
  0x12   : > { %4142 = vst [vmem:[#allocation4_spill] sm:$0xff] %v2733_v7  ;;  %v2750_v11 = vrot.slane %v335_v2, %v2729_v5  ;;  %v2756_v13 = vld [vmem:[%s2738_s20 + $0x61] sm:$0xff]  ;;  %v2762_v15 = vrot.slane %v335_v2, %v2731_v6  ;;  %v2765_v16 = vrot.slane %v335_v2, %v2733_v7  ;;  %v2768_v17 = vrot.slane %v336_v4, %v2729_v5  ;;  %v2783_v23 = vld [vmem:[%s2738_s20 + $0x71] sm:$0xff] }
  0x13   : > { %v2759_v14 = vld [vmem:[%s2738_s20 + $0x62] sm:$0xff]  ;;  %v2771_v18 = vrot.slane %v336_v4, %v2731_v6  ;;  %v361_v19 = vmul.f32 %v2741_v8, %v2753_v12  ;;  %v429_v20 = vmul.f32 %v2744_v9, %v2756_v13  ;;  %v2786_v24 = vld [vmem:[%s2738_s20 + $0x72] sm:$0xff]  ;;  %v2789_v25 = vrot.slane %v336_v4, %v2733_v7 }
  0x14   : > { %v497_v21 = vmul.f32 %v2747_v10, %v2759_v14  ;;  %v566_v26 = vmul.f32 %v2780_v22, %v2750_v11  ;;  %v2794_v27 = vld [vmem:[%s2738_s20 + $0x80] sm:$0xff]  ;;  %v362_v30 = vmul.f32 %v2780_v22, %v2741_v8  ;;  %v634_v32 = vmul.f32 %v2783_v23, %v2762_v15  ;;  %v2811_v35 = vld [vmem:[%s2738_s20 + $0x90] sm:$0xff] }
  0x15   : > { %v2797_v28 = vld [vmem:[%s2738_s20 + $0x81] sm:$0xff]  ;;  %v437_v31 = vadd.f32 %v429_v20, %v361_v19  ;;  %v702_v33 = vmul.f32 %v2786_v24, %v2765_v16  ;;  %v771_v34 = vmul.f32 %v2794_v27, %v2768_v17  ;;  %4144 = vst [vmem:[#allocation6_spill] sm:$0xff] %v2811_v35  ;;  %v2814_v36 = vld [vmem:[%s2738_s20 + $0x91] sm:$0xff]  ;;  %v430_v40 = vmul.f32 %v2783_v23, %v2744_v9 }
  0x16   : > { %v2800_v29 = vld [vmem:[%s2738_s20 + $0x82] sm:$0xff]  ;;  %4145 = vst [vmem:[#allocation7_spill] sm:$0xff] %v2814_v36  ;;  %v2817_v37 = vld [vmem:[%s2738_s20 + $0x92] sm:$0xff]  ;;  %v839_v38 = vmul.f32 %v2797_v28, %v2771_v18  ;;  %v498_v41 = vmul.f32 %v2786_v24, %v2747_v10  ;;  %v567_v46 = vmul.f32 %v2794_v27, %v2750_v11  ;;  %v635_v47 = vmul.f32 %v2797_v28, %v2762_v15 }
  0x17   : > { %4143 = vst [vmem:[#allocation5_spill] sm:$0xff] %v2800_v29  ;;  %4146 = vst [vmem:[#allocation8_spill] sm:$0xff] %v2817_v37  ;;  %v2823_v39 = vmul.f32 %v2800_v29, %v2789_v25  ;;  %v2830_v42 = vld [vmem:[%s2738_s20 + $0x40] sm:$0xff]  ;;  %v505_v45 = vadd.f32 %v497_v21, %v437_v31  ;;  %v703_v48 = vmul.f32 %v2800_v29, %v2765_v16  ;;  %v2845_v49 = vld [vmem:[%s2738_s20 + $0x50] sm:$0xff] }
  0x18   : > { %v2833_v43 = vld [vmem:[%s2738_s20 + $0x41] sm:$0xff]  ;;  %v438_v50 = vadd.f32 %v430_v40, %v362_v30  ;;  %v772_v51 = vmul.f32 %v2811_v35, %v2768_v17  ;;  %v359_v52 = vmul.f32 %v2741_v8, %v2830_v42  ;;  %v840_v55 = vmul.f32 %v2814_v36, %v2771_v18  ;;  %v2860_v58 = vld [vmem:[%s2738_s20 + $0x51] sm:$0xff] }
  0x19   : > { %v2836_v44 = vld [vmem:[%s2738_s20 + $0x42] sm:$0xff]  ;;  %v427_v53 = vmul.f32 %v2744_v9, %v2833_v43  ;;  %v574_v54 = vadd.f32 %v566_v26, %v505_v45  ;;  %v908_v56 = vmul.f32 %v2817_v37, %v2789_v25  ;;  %v2863_v59 = vld [vmem:[%s2738_s20 + $0x52] sm:$0xff]  ;;  %v564_v62 = vmul.f32 %v2845_v49, %v2750_v11 }
  0x1a   : > { %v495_v57 = vmul.f32 %v2747_v10, %v2836_v44  ;;  %v506_v60 = vadd.f32 %v498_v41, %v438_v50  ;;  %v632_v63 = vmul.f32 %v2860_v58, %v2762_v15  ;;  %v700_v1 = vmul.f32 %v2863_v59, %v2765_v16  ;;  %v2880_v26 = vld [vmem:[%s2738_s20 + $0x20] sm:$0xff] }
  0x1b   : > { %v435_v61 = vadd.f32 %v427_v53, %v359_v52  ;;  %v642_v0 = vadd.f32 %v634_v32, %v574_v54  ;;  %v769_v2 = vmul.f32 %v2768_v17, %v2753_v12  ;;  %v360_v3 = vmul.f32 %v2845_v49, %v2741_v8  ;;  %v2889_v41 = vld [vmem:[%s2738_s20 + $0x21] sm:$0xff] }
  0x1c   : > { %v575_v4 = vadd.f32 %v567_v46, %v506_v60  ;;  %v428_v20 = vmul.f32 %v2860_v58, %v2744_v9  ;;  %v496_v21 = vmul.f32 %v2863_v59, %v2747_v10  ;;  %v837_v31 = vmul.f32 %v2771_v18, %v2756_v13  ;;  %v2894_v53 = vld [vmem:[%s2738_s20 + $0x22] sm:$0xff] }
  0x1d   : > { %v503_v19 = vadd.f32 %v495_v57, %v435_v61  ;;  %v710_v30 = vadd.f32 %v702_v33, %v642_v0  ;;  %v905_v32 = vmul.f32 %v2789_v25, %v2759_v14  ;;  %v565_v40 = vmul.f32 %v2750_v11, %v2753_v12  ;;  %v2897_v33 = vld [vmem:[%s2738_s20 + $0x30] sm:$0xff] }
  0x1e   : > { %v643_v45 = vadd.f32 %v635_v47, %v575_v4  ;;  %v436_v50 = vadd.f32 %v428_v20, %v360_v3  ;;  %v633_v52 = vmul.f32 %v2762_v15, %v2756_v13  ;;  %v701_v57 = vmul.f32 %v2765_v16, %v2759_v14 }
  0x1f   : > { %v572_v46 = vadd.f32 %v564_v62, %v503_v19  ;;  %v779_v54 = vadd.f32 %v771_v34, %v710_v30  ;;  %v770_v60 = vmul.f32 %v2780_v22, %v2768_v17  ;;  %v357_v47 = vmul.f32 %v2741_v8, %v2880_v26  ;;  %v2916_v30 = vld [vmem:[%s4112_s2] ss:$0 sm:$0xff] }
  0x20   : > { %v711_v61 = vadd.f32 %v703_v48, %v643_v45  ;;  %v504_v0 = vadd.f32 %v496_v21, %v436_v50  ;;  %v425_v3 = vmul.f32 %v2744_v9, %v2889_v41  ;;  %v838_v34 = vmul.f32 %v2783_v23, %v2771_v18 }
  0x21   : > { %v640_v62 = vadd.f32 %v632_v63, %v572_v46  ;;  %v847_v4 = vadd.f32 %v839_v38, %v779_v54  ;;  %v493_v19 = vmul.f32 %v2747_v10, %v2894_v53  ;;  %v562_v20 = vmul.f32 %v2897_v33, %v2750_v11  ;;  %v2919_v46 = vld [vmem:[%s2738_s20 + $0x31] sm:$0xff] }
  0x22   : > { %v780_v48 = vadd.f32 %v772_v51, %v711_v61  ;;  %v573_v21 = vadd.f32 %v565_v40, %v504_v0  ;;  %v433_v45 = vadd.f32 %v425_v3, %v357_v47  ;;  %v2922_v38 = vld [vmem:[%s2738_s20 + $0x32] sm:$0xff]  ;;  %v906_v54 = vmul.f32 %v2786_v24, %v2789_v25 }
  0x23   : > { %v708_v63 = vadd.f32 %v700_v1, %v640_v62  ;;  %v915_v50 = vadd.f32 %v2823_v39, %v847_v4  ;;  %v630_v37 = vmul.f32 %v2919_v46, %v2762_v15  ;;  %v698_v36 = vmul.f32 %v2922_v38, %v2765_v16 }
  0x24   : > { %v848_v35 = vadd.f32 %v840_v55, %v780_v48  ;;  %v641_v1 = vadd.f32 %v633_v52, %v573_v21  ;;  %v501_v40 = vadd.f32 %v493_v19, %v433_v45  ;;  %v767_v61 = vmul.f32 %v2768_v17, %v2830_v42 }
  0x25   : > { %v777_v51 = vadd.f32 %v769_v2, %v708_v63  ;;  %v2932_v47 = vadd.f32 %v2916_v30, %v915_v50  ;;  %v358_v39 = vmul.f32 %v2897_v33, %v2741_v8  ;;  %v426_v62 = vmul.f32 %v2919_v46, %v2744_v9 }
  0x26   : > { %v916_v0 = vadd.f32 %v908_v56, %v848_v35  ;;  %v709_v4 = vadd.f32 %v701_v57, %v641_v1  ;;  %v570_v29 = vadd.f32 %v562_v20, %v501_v40  ;;  %v494_v52 = vmul.f32 %v2922_v38, %v2747_v10 }
  0x27   : > { %v845_v3 = vadd.f32 %v837_v31, %v777_v51  ;;  %v4129_v55 = vmax.f32 %v2932_v47, 0.0  ;;  %v434_v2 = vadd.f32 %v426_v62, %v358_v39  ;;  %v563_v19 = vmul.f32 %v2750_v11, %v2830_v42  ;;  %v2966_v51 = vld [vmem:[%s2738_s20 + $0x2] sm:$0xff] }
  0x28   : > { %v2946_v48 = vadd.f32 %v2916_v30, %v916_v0  ;;  %v778_v35 = vadd.f32 %v770_v60, %v709_v4  ;;  %v638_v56 = vadd.f32 %v630_v37, %v570_v29  ;;  %v835_v57 = vmul.f32 %v2771_v18, %v2833_v43  ;;  %v2960_v37 = vld [vmem:[%s2738_s20] sm:$0xff]  ;;  %v2979_v4 = vld [vmem:[%s2738_s20 + $0x10] sm:$0xff] }
  0x29   : > { %v913_v63 = vadd.f32 %v905_v32, %v845_v3  ;;  %v997_v31 = vsel %vm978_vm0, %v4129_v55, 0.0  ;;  %v502_v20 = vadd.f32 %v494_v52, %v434_v2  ;;  %v631_v21 = vmul.f32 %v2762_v15, %v2833_v43  ;;  %v2963_v60 = vld [vmem:[%s2738_s20 + $0x1] sm:$0xff] }
  0x2a   : > { %998 = vadd.xlane.f32.xlu0 %v997_v31  ;;  %v4128_v45 = vmax.f32 %v2946_v48, 0.0  ;;  %v846_v32 = vadd.f32 %v838_v34, %v778_v35  ;;  %v706_v29 = vadd.f32 %v698_v36, %v638_v56  ;;  %v903_v1 = vmul.f32 %v2789_v25, %v2836_v44 }
  0x2b   : > { %v2957_v50 = vadd.f32 %v2916_v30, %v913_v63  ;;  %v571_v40 = vadd.f32 %v563_v19, %v502_v20  ;;  %v699_v39 = vmul.f32 %v2765_v16, %v2836_v44  ;;  %v768_v62 = vmul.f32 %v2845_v49, %v2768_v17 }
  0x2c   : > { %v1000_v36 = vsel %vm978_vm0, %v4128_v45, 0.0  ;;  %v914_v0 = vadd.f32 %v906_v54, %v846_v32  ;;  %v775_v3 = vadd.f32 %v767_v61, %v706_v29  ;;  %v355_v52 = vmul.f32 %v2741_v8, %v2960_v37  ;;  %v2998_v32 = vld [vmem:[%s2738_s20 + $0x11] sm:$0xff] }
  0x2d   : > { %v4126_v34 = vmax.f32 %v2957_v50, 0.0  ;;  %v639_v2 = vadd.f32 %v631_v21, %v571_v40  ;;  %v423_v19 = vmul.f32 %v2744_v9, %v2963_v60  ;;  %v491_v63 = vmul.f32 %v2747_v10, %v2966_v51  ;;  %v3001_v29 = vld [vmem:[%s2738_s20 + $0x12] sm:$0xff] }
  0x2e   : > { %1001 = vadd.xlane.f32.xlu0 %v1000_v36  ;;  %v2991_v61 = vadd.f32 %v2916_v30, %v914_v0  ;;  %v843_v35 = vadd.f32 %v835_v57, %v775_v3  ;;  %v836_v31 = vmul.f32 %v2860_v58, %v2771_v18  ;;  %v560_v21 = vmul.f32 %v2979_v4, %v2750_v11 }
  0x2f   : > { %v991_v54 = vsel %vm978_vm0, %v4126_v34, 0.0  ;;  %v707_v56 = vadd.f32 %v699_v39, %v639_v2  ;;  %v431_v20 = vadd.f32 %v423_v19, %v355_v52  ;;  %v904_v0 = vmul.f32 %v2863_v59, %v2789_v25 }
  0x30   : > { %992 = vadd.xlane.f32.xlu1 %v991_v54  ;;  %v4125_v40 = vmax.f32 %v2991_v61, 0.0  ;;  %v911_v36 = vadd.f32 %v903_v1, %v843_v35  ;;  %v628_v57 = vmul.f32 %v2998_v32, %v2762_v15  ;;  %v696_v2 = vmul.f32 %v3001_v29, %v2765_v16 }
  0x31   : > { %v776_v39 = vadd.f32 %v768_v62, %v707_v56  ;;  %v499_v3 = vadd.f32 %v491_v63, %v431_v20  ;;  %v356_v52 = vmul.f32 %v2979_v4, %v2741_v8  ;;  %v424_v54 = vmul.f32 %v2998_v32, %v2744_v9  ;;  %v337_v20 = vld [vmem:[%s4111_s1 + $0xc] sm:$0x7] }
  0x32   : > { %v994_v19 = vsel %vm978_vm0, %v4125_v40, 0.0  ;;  %v3016_v1 = vadd.f32 %v2916_v30, %v911_v36  ;;  %v492_v62 = vmul.f32 %v3001_v29, %v2747_v10  ;;  %v765_v56 = vmul.f32 %v2768_v17, %v2880_v26 }
  0x33   : > { %v844_v63 = vadd.f32 %v836_v31, %v776_v39  ;;  %v568_v35 = vadd.f32 %v560_v21, %v499_v3  ;;  %v833_v8 = vmul.f32 %v2771_v18, %v2889_v41  ;;  %v901_v9 = vmul.f32 %v2789_v25, %v2894_v53  ;;  %v338_v31 = vld [vmem:[%s4111_s1 + $0x10] sm:$0x7] }
  0x34   : > { %4147 = vst [vmem:[#allocation9_spill] sm:$0xff] %v3016_v1  ;;  %995 = vadd.xlane.f32.xlu1 %v994_v19  ;;  %v4127_v36 = vmax.f32 %v3016_v1, 0.0  ;;  %v432_v40 = vadd.f32 %v424_v54, %v356_v52  ;;  %v561_v10 = vmul.f32 %v2750_v11, %v2880_v26  ;;  %v629_v3 = vmul.f32 %v2762_v15, %v2889_v41 }
  0x35   : > { %v912_v21 = vadd.f32 %v904_v0, %v844_v63  ;;  %v636_v39 = vadd.f32 %v628_v57, %v568_v35  ;;  %v697_v19 = vmul.f32 %v2765_v16, %v2894_v53  ;;  %v3045_v54 = vrot.slane %v337_v20, %v2729_v5 }
  0x36   : > { %v985_v34 = vsel %vm978_vm0, %v4127_v36, 0.0  ;;  %v500_v52 = vadd.f32 %v492_v62, %v432_v40  ;;  %v3048_v11 = vrot.slane %v337_v20, %v2731_v6  ;;  %v3054_v15 = vrot.slane %v337_v20, %v2733_v7  ;;  %v339_v40 = vld [vmem:[%s4111_s1 + $0x14] sm:$0x7] }
  0x37   : > { %986 = vadd.xlane.f32.xlu0 %v985_v34  ;;  %v3051_v0 = vadd.f32 %v2916_v30, %v912_v21  ;;  %v704_v57 = vadd.f32 %v696_v2, %v636_v39  ;;  %v3057_v16 = vrot.slane %v338_v31, %v2729_v5  ;;  %v381_v62 = vmul.f32 %v3045_v54, %v2753_v12 }
  0x38   : > { %v569_v63 = vadd.f32 %v561_v10, %v500_v52  ;;  %v449_v34 = vmul.f32 %v3048_v11, %v2756_v13  ;;  %v3067_v35 = vrot.slane %v338_v31, %v2731_v6  ;;  %v766_v21 = vmul.f32 %v2897_v33, %v2768_v17 }
  0x39   : > { %v4131_v2 = vmax.f32 %v3051_v0, 0.0  ;;  %v773_v20 = vadd.f32 %v765_v56, %v704_v57  ;;  %v517_v10 = vmul.f32 %v3054_v15, %v2759_v14  ;;  %v586_v36 = vmul.f32 %v2780_v22, %v3057_v16 }
  0x3a   : > { %v637_v39 = vadd.f32 %v629_v3, %v569_v63  ;;  %v457_v52 = vadd.f32 %v449_v34, %v381_v62  ;;  %v3077_v45 = vrot.slane %v338_v31, %v2733_v7  ;;  %v834_v56 = vmul.f32 %v2919_v46, %v2771_v18 }
  0x3b   : > { %v988_v55 = vsel %vm978_vm0, %v4131_v2, 0.0  ;;  %v841_v1 = vadd.f32 %v833_v8, %v773_v20  ;;  %v3085_v17 = vrot.slane %v339_v40, %v2729_v5  ;;  %v902_v57 = vmul.f32 %v2922_v38, %v2789_v25 }
  0x3c   : > { %989 = vadd.xlane.f32.xlu1 %v988_v55  ;;  %v705_v3 = vadd.f32 %v697_v19, %v637_v39  ;;  %v525_v63 = vadd.f32 %v517_v10, %v457_v52  ;;  %v654_v31 = vmul.f32 %v2783_v23, %v3067_v35  ;;  %v3092_v34 = vrot.slane %v339_v40, %v2731_v6 }
  0x3d   : > { %v909_v62 = vadd.f32 %v901_v9, %v841_v1  ;;  %v3095_v8 = vrot.slane %v339_v40, %v2733_v7  ;;  %v382_v18 = vmul.f32 %v2780_v22, %v3045_v54  ;;  %v722_v19 = vmul.f32 %v2786_v24, %v3077_v45 }
  0x3e   : > { %v774_v20 = vadd.f32 %v766_v21, %v705_v3  ;;  %v594_v55 = vadd.f32 %v586_v36, %v525_v63  ;;  %v450_v25 = vmul.f32 %v2783_v23, %v3048_v11  ;;  %v791_v1 = vmul.f32 %v2794_v27, %v3085_v17  ;;  %v4149_v63 = vld [vmem:[#allocation5_spill] sm:$0xff] }
  0x3f   : > { %v3104_v10 = vadd.f32 %v2916_v30, %v909_v62  ;;  %v518_v9 = vmul.f32 %v2786_v24, %v3054_v15  ;;  %v587_v36 = vmul.f32 %v2794_v27, %v3057_v16  ;;  %v859_v3 = vmul.f32 %v2797_v28, %v3092_v34 }
  0x40   : > { %v842_v40 = vadd.f32 %v834_v56, %v774_v20  ;;  %v662_v39 = vadd.f32 %v654_v31, %v594_v55  ;;  %v458_v52 = vadd.f32 %v450_v25, %v382_v18  ;;  %v927_v62 = vmul.f32 %v4149_v63, %v3095_v8 }
  0x41   : > { %4148 = vst [vmem:[#allocation10_spill] sm:$0xff] %v3104_v10  ;;  %v4138_v21 = vmax.f32 %v3104_v10, 0.0  ;;  %v655_v2 = vmul.f32 %v2797_v28, %v3067_v35  ;;  %v379_v56 = vmul.f32 %v3045_v54, %v2830_v42  ;;  %v723_v31 = vmul.f32 %v4149_v63, %v3077_v45 }
  0x42   : > { %v910_v7 = vadd.f32 %v902_v57, %v842_v40  ;;  %v730_v6 = vadd.f32 %v722_v19, %v662_v39  ;;  %v526_v5 = vadd.f32 %v518_v9, %v458_v52  ;;  %v447_v18 = vmul.f32 %v3048_v11, %v2833_v43  ;;  %v4150_v19 = vld [vmem:[#allocation6_spill] sm:$0xff]  ;;  %v4151_v9 = vld [vmem:[#allocation7_spill] sm:$0xff]  ;;  %v4152_v39 = vld [vmem:[#allocation8_spill] sm:$0xff] }
  0x43   : > { %v979_v27 = vsel %vm978_vm0, %v4138_v21, 0.0  ;;  %v515_v20 = vmul.f32 %v3054_v15, %v2836_v44  ;;  %v792_v25 = vmul.f32 %v4150_v19, %v3085_v17  ;;  %v860_v40 = vmul.f32 %v4151_v9, %v3092_v34 }
  0x44   : > { %980 = vadd.xlane.f32.xlu0 %v979_v27  ;;  %v3131_v28 = vadd.f32 %v2916_v30, %v910_v7  ;;  %v799_v57 = vadd.f32 %v791_v1, %v730_v6  ;;  %v595_v55 = vadd.f32 %v587_v36, %v526_v5  ;;  %v928_v52 = vmul.f32 %v4152_v39, %v3095_v8  ;;  %v3147_v6 = vld [vmem:[%s4112_s2 + $0x1] ss:$0 sm:$0xff] }
  0x45   : > { %v455_v63 = vadd.f32 %v447_v18, %v379_v56  ;;  %v584_v21 = vmul.f32 %v2845_v49, %v3057_v16  ;;  %v652_v5 = vmul.f32 %v2860_v58, %v3067_v35  ;;  %v380_v1 = vmul.f32 %v2845_v49, %v3045_v54 }
  0x46   : > { %v971_v27 = vmax.f32 %v3131_v28, 0.0  ;;  %v867_v10 = vadd.f32 %v859_v3, %v799_v57  ;;  %v663_v7 = vadd.f32 %v655_v2, %v595_v55  ;;  %v448_v36 = vmul.f32 %v2860_v58, %v3048_v11 }
  0x47   : > { %v523_v30 = vadd.f32 %v515_v20, %v455_v63  ;;  %v516_v56 = vmul.f32 %v2863_v59, %v3054_v15  ;;  %v720_v57 = vmul.f32 %v2863_v59, %v3077_v45  ;;  %v789_v55 = vmul.f32 %v3085_v17, %v2753_v12 }
  0x48   : > { %v982_v2 = vsel %vm978_vm0, %v971_v27, 0.0  ;;  %v935_v3 = vadd.f32 %v927_v62, %v867_v10  ;;  %v731_v18 = vadd.f32 %v723_v31, %v663_v7  ;;  %v456_v19 = vadd.f32 %v448_v36, %v380_v1 }
  0x49   : > { %983 = vadd.xlane.f32.xlu1 %v982_v2  ;;  %v592_v20 = vadd.f32 %v584_v21, %v523_v30  ;;  %v585_v9 = vmul.f32 %v3057_v16, %v2753_v12  ;;  %v857_v10 = vmul.f32 %v3092_v34, %v2756_v13  ;;  %v925_v62 = vmul.f32 %v3095_v8, %v2759_v14 }
  0x4a   : > { %v3165_v39 = vadd.f32 %v3147_v6, %v935_v3  ;;  %v800_v63 = vadd.f32 %v792_v25, %v731_v18  ;;  %v524_v7 = vadd.f32 %v516_v56, %v456_v19  ;;  %v653_v21 = vmul.f32 %v3067_v35, %v2756_v13 }
  0x4b   : > { %v660_v31 = vadd.f32 %v652_v5, %v592_v20  ;;  %v377_v30 = vmul.f32 %v3045_v54, %v2880_v26  ;;  %v445_v25 = vmul.f32 %v3048_v11, %v2889_v41  ;;  %v513_v36 = vmul.f32 %v3054_v15, %v2894_v53 }
  0x4c   : > { %v1129_v12 = vmax.f32 %v3165_v39, 0.0  ;;  %v868_v1 = vadd.f32 %v860_v40, %v800_v63  ;;  %v593_v3 = vadd.f32 %v585_v9, %v524_v7  ;;  %v721_v5 = vmul.f32 %v3077_v45, %v2759_v14 }
  0x4d   : > { %v728_v2 = vadd.f32 %v720_v57, %v660_v31  ;;  %v790_v13 = vmul.f32 %v2780_v22, %v3085_v17  ;;  %v453_v40 = vadd.f32 %v445_v25, %v377_v30  ;;  %v582_v20 = vmul.f32 %v2897_v33, %v3057_v16 }
  0x4e   : > { %v1149_v56 = vsel %vm978_vm0, %v1129_v12, 0.0  ;;  %v936_v18 = vadd.f32 %v928_v52, %v868_v1  ;;  %v661_v63 = vadd.f32 %v653_v21, %v593_v3  ;;  %v858_v57 = vmul.f32 %v2783_v23, %v3092_v34 }
  0x4f   : > { %1150 = vadd.xlane.f32.xlu0 %v1149_v56  ;;  %v797_v19 = vadd.f32 %v789_v55, %v728_v2  ;;  %v926_v14 = vmul.f32 %v2786_v24, %v3095_v8  ;;  %v521_v9 = vadd.f32 %v513_v36, %v453_v40  ;;  %v650_v52 = vmul.f32 %v2919_v46, %v3067_v35 }
  0x50   : > { %v3194_v22 = vadd.f32 %v3147_v6, %v936_v18  ;;  %v378_v31 = vmul.f32 %v2897_v33, %v3045_v54  ;;  %v729_v30 = vadd.f32 %v721_v5, %v661_v63  ;;  %v446_v55 = vmul.f32 %v2919_v46, %v3048_v11 }
  0x51   : > { %v865_v7 = vadd.f32 %v857_v10, %v797_v19  ;;  %v514_v23 = vmul.f32 %v2922_v38, %v3054_v15  ;;  %v590_v21 = vadd.f32 %v582_v20, %v521_v9  ;;  %v718_v1 = vmul.f32 %v2922_v38, %v3077_v45 }
  0x52   : > { %v1130_v24 = vmax.f32 %v3194_v22, 0.0  ;;  %v787_v25 = vmul.f32 %v3085_v17, %v2830_v42  ;;  %v798_v2 = vadd.f32 %v790_v13, %v729_v30  ;;  %v454_v3 = vadd.f32 %v446_v55, %v378_v31 }
  0x53   : > { %v933_v36 = vadd.f32 %v925_v62, %v865_v7  ;;  %v583_v10 = vmul.f32 %v3057_v16, %v2830_v42  ;;  %v658_v56 = vadd.f32 %v650_v52, %v590_v21  ;;  %v855_v18 = vmul.f32 %v3092_v34, %v2833_v43 }
  0x54   : > { %v1152_v5 = vsel %vm978_vm0, %v1130_v24, 0.0  ;;  %v923_v40 = vmul.f32 %v3095_v8, %v2836_v44  ;;  %v866_v62 = vadd.f32 %v858_v57, %v798_v2  ;;  %v522_v13 = vadd.f32 %v514_v23, %v454_v3 }
  0x55   : > { %1153 = vadd.xlane.f32.xlu1 %v1152_v5  ;;  %v3219_v20 = vadd.f32 %v3147_v6, %v933_v36  ;;  %v651_v42 = vmul.f32 %v3067_v35, %v2833_v43  ;;  %v726_v19 = vadd.f32 %v718_v1, %v658_v56  ;;  %v375_v63 = vmul.f32 %v3045_v54, %v2960_v37 }
  0x56   : > { %v443_v9 = vmul.f32 %v3048_v11, %v2963_v60  ;;  %v511_v52 = vmul.f32 %v3054_v15, %v2966_v51  ;;  %v934_v7 = vadd.f32 %v926_v14, %v866_v62  ;;  %v591_v30 = vadd.f32 %v583_v10, %v522_v13 }
  0x57   : > { %v1127_v31 = vmax.f32 %v3219_v20, 0.0  ;;  %v719_v57 = vmul.f32 %v3077_v45, %v2836_v44  ;;  %v795_v55 = vadd.f32 %v787_v25, %v726_v19  ;;  %v788_v43 = vmul.f32 %v2845_v49, %v3085_v17 }
  0x58   : > { %v451_v23 = vadd.f32 %v443_v9, %v375_v63  ;;  %v580_v37 = vmul.f32 %v2979_v4, %v3057_v16  ;;  %v3240_v51 = vadd.f32 %v3147_v6, %v934_v7  ;;  %v659_v14 = vadd.f32 %v651_v42, %v591_v30 }
  0x59   : > { %v1143_v60 = vsel %vm978_vm0, %v1127_v31, 0.0  ;;  %v856_v21 = vmul.f32 %v2860_v58, %v3092_v34  ;;  %v863_v44 = vadd.f32 %v855_v18, %v795_v55  ;;  %v924_v49 = vmul.f32 %v2863_v59, %v3095_v8 }
  0x5a   : > { %1144 = vadd.xlane.f32.xlu0 %v1143_v60  ;;  %v519_v1 = vadd.f32 %v511_v52, %v451_v23  ;;  %v648_v25 = vmul.f32 %v2998_v32, %v3067_v35  ;;  %v1128_v36 = vmax.f32 %v3240_v51, 0.0  ;;  %v727_v2 = vadd.f32 %v719_v57, %v659_v14 }
  0x5b   : > { %v376_v3 = vmul.f32 %v2979_v4, %v3045_v54  ;;  %v444_v10 = vmul.f32 %v2998_v32, %v3048_v11  ;;  %v931_v5 = vadd.f32 %v923_v40, %v863_v44  ;;  %v716_v56 = vmul.f32 %v3001_v29, %v3077_v45 }
  0x5c   : > { %v588_v58 = vadd.f32 %v580_v37, %v519_v1  ;;  %v512_v59 = vmul.f32 %v3001_v29, %v3054_v15  ;;  %v1146_v18 = vsel %vm978_vm0, %v1128_v36, 0.0  ;;  %v796_v62 = vadd.f32 %v788_v43, %v727_v2 }
  0x5d   : > { %v452_v13 = vadd.f32 %v444_v10, %v376_v3  ;;  %v581_v4 = vmul.f32 %v3057_v16, %v2880_v26  ;;  %1147 = vadd.xlane.f32.xlu1 %v1146_v18  ;;  %v3263_v32 = vadd.f32 %v3147_v6, %v931_v5  ;;  %v785_v11 = vmul.f32 %v3085_v17, %v2880_v26 }
  0x5e   : > { %v656_v54 = vadd.f32 %v648_v25, %v588_v58  ;;  %v864_v40 = vadd.f32 %v856_v21, %v796_v62  ;;  %v649_v29 = vmul.f32 %v3067_v35, %v2889_v41  ;;  %v853_v63 = vmul.f32 %v3092_v34, %v2889_v41 }
  0x5f   : > { %v520_v42 = vadd.f32 %v512_v59, %v452_v13  ;;  %v1125_v15 = vmax.f32 %v3263_v32, 0.0  ;;  %v717_v52 = vmul.f32 %v3077_v45, %v2894_v53  ;;  %v921_v30 = vmul.f32 %v3095_v8, %v2894_v53 }
  0x60   : > { %v724_v19 = vadd.f32 %v716_v56, %v656_v54  ;;  %v932_v16 = vadd.f32 %v924_v49, %v864_v40  ;;  %v786_v41 = vmul.f32 %v2897_v33, %v3085_v17  ;;  %v854_v23 = vmul.f32 %v2919_v46, %v3092_v34 }
  0x61   : > { %v589_v9 = vadd.f32 %v581_v4, %v520_v42  ;;  %v1137_v26 = vsel %vm978_vm0, %v1125_v15, 0.0  ;;  %v922_v14 = vmul.f32 %v2922_v38, %v3095_v8  ;;  %v4153_v25 = vmax.f32 %v2932_v47, 0.0 }
  0x62   : > { %v793_v7 = vadd.f32 %v785_v11, %v724_v19  ;;  %1138 = vadd.xlane.f32.xlu0 %v1137_v26  ;;  %v3280_v35 = vadd.f32 %v3147_v6, %v932_v16  ;;  %v4154_v56 = vmax.f32 %v2946_v48, 0.0  ;;  %v4155_v62 = vmax.f32 %v2957_v50, 0.0  ;;  %v4157_v16 = vld [vmem:[#allocation9_spill] sm:$0xff] }
  0x63   : > { %v657_v57 = vadd.f32 %v649_v29, %v589_v9  ;;  %v4156_v48 = vmax.f32 %v2991_v61, 0.0  ;;  %v4158_v9 = vmax.f32 %v4157_v16, 0.0 }
  0x64   : > { %v861_v55 = vadd.f32 %v853_v63, %v793_v7  ;;  %v1126_v43 = vmax.f32 %v3280_v35, 0.0 }
  0x65   : > { %v725_v45 = vadd.f32 %v717_v52, %v657_v57 }
  0x66   : > { %v929_v37 = vadd.f32 %v921_v30, %v861_v55  ;;  %v1140_v53 = vsel %vm978_vm0, %v1126_v43, 0.0 }
  0x67   : > { %v794_v60 = vadd.f32 %v786_v41, %v725_v45  ;;  %1141 = vadd.xlane.f32.xlu1 %v1140_v53  ;;  %v4159_v41 = vmax.f32 %v3051_v0, 0.0 }
  0x68   : > { %v3293_v21 = vadd.f32 %v3147_v6, %v929_v37 }
  0x69   : > { %v862_v33 = vadd.f32 %v854_v23, %v794_v60  ;;  %v4160_v60 = vld [vmem:[#allocation10_spill] sm:$0xff] }
  0x6a   : > { %v1123_v17 = vmax.f32 %v3293_v21, 0.0 }
  0x6b   : > { %v930_v44 = vadd.f32 %v922_v14, %v862_v33  ;;  %v4161_v14 = vmax.f32 %v4160_v60, 0.0 }
  0x6c   : > { %v1131_v46 = vsel %vm978_vm0, %v1123_v17, 0.0 }
  0x6d   : > { %1132 = vadd.xlane.f32.xlu0 %v1131_v46  ;;  %v3300_v34 = vadd.f32 %v3147_v6, %v930_v44 }
  0x6f   : > { %v1124_v49 = vmax.f32 %v3300_v34, 0.0  ;;  %v1418_v34 = vld [vmem:[%s4116_s6] sm:$0xff] }
  0x71   : > { %v1134_v38 = vsel %vm978_vm0, %v1124_v49, 0.0 }
  0x72   : > { %1135 = vadd.xlane.f32.xlu1 %v1134_v38 }
  0xb3   : > { %v999_v8 = vpop.xlane.xlu0 %998 }
  0xb4   : > { %v1010_v1 = vmul.f32 0.0625, %v999_v8 }
  0xb6   : > { %v3308_v2 = vsub.f32 %v4153_v25, %v1010_v1 }
  0xb7   : > { %v1002_v3 = vpop.xlane.xlu0 %1001 }
  0xb8   : > { %v1011_v10 = vmul.f32 0.0625, %v1002_v3  ;;  %v1026_v6 = vmul.f32 %v3308_v2, %v3308_v2 }
  0xb9   : > { %v993_v5 = vpop.xlane.xlu1 %992 }
  0xba   : > { %v1008_v58 = vmul.f32 0.0625, %v993_v5  ;;  %v3314_v59 = vsub.f32 %v4154_v56, %v1011_v10  ;;  %v1046_v18 = vsel %vm978_vm0, %v1026_v6, 0.0 }
  0xbb   : > { %1047 = vadd.xlane.f32.xlu0 %v1046_v18 }
  0xbc   : > { %v3319_v13 = vsub.f32 %v4155_v62, %v1008_v58  ;;  %v1027_v4 = vmul.f32 %v3314_v59, %v3314_v59 }
  0xbd   : > { %v996_v47 = vpop.xlane.xlu1 %995 }
  0xbe   : > { %v1009_v54 = vmul.f32 0.0625, %v996_v47  ;;  %v1024_v11 = vmul.f32 %v3319_v13, %v3319_v13  ;;  %v1049_v40 = vsel %vm978_vm0, %v1027_v4, 0.0 }
  0xbf   : > { %1050 = vadd.xlane.f32.xlu1 %v1049_v40 }
  0xc0   : > { %v3328_v42 = vsub.f32 %v4156_v48, %v1009_v54  ;;  %v1040_v50 = vsel %vm978_vm0, %v1024_v11, 0.0  ;;  %v987_v29 = vpop.xlane.xlu0 %986 }
  0xc1   : > { %1041 = vadd.xlane.f32.xlu0 %v1040_v50  ;;  %v1006_v19 = vmul.f32 0.0625, %v987_v29 }
  0xc2   : > { %v1025_v63 = vmul.f32 %v3328_v42, %v3328_v42 }
  0xc3   : > { %v3335_v52 = vsub.f32 %v4158_v9, %v1006_v19 }
  0xc4   : > { %v1043_v26 = vsel %vm978_vm0, %v1025_v63, 0.0 }
  0xc5   : > { %1044 = vadd.xlane.f32.xlu1 %v1043_v26  ;;  %v990_v7 = vpop.xlane.xlu1 %989  ;;  %v1022_v61 = vmul.f32 %v3335_v52, %v3335_v52 }
  0xc6   : > { %v1007_v30 = vmul.f32 0.0625, %v990_v7 }
  0xc7   : > { %v1034_v57 = vsel %vm978_vm0, %v1022_v61, 0.0 }
  0xc8   : > { %v3343_v55 = vsub.f32 %v4159_v41, %v1007_v30  ;;  %1035 = vadd.xlane.f32.xlu0 %v1034_v57  ;;  %v2658_v41 = vmov 0  }
  0xc9   : > { %2500 = vset.pattern.permute.xlu0 %v2658_v41  ;;  %2501 = vset.pattern.permute.xlu1 %v2658_v41 }
  0xca   : > { %v1023_v45 = vmul.f32 %v3343_v55, %v3343_v55 }
  0xcc   : > { %v1037_v23 = vsel %vm978_vm0, %v1023_v45, 0.0  ;;  %v2338_v45 = vld [vmem:[%s4116_s6 + $0x10] sm:$0xff] }
  0xcd   : > { %v981_v37 = vpop.xlane.xlu0 %980  ;;  %1038 = vadd.xlane.f32.xlu1 %v1037_v23  ;;  %v2339_v23 = vld [vmem:[%s4116_s6 + $0x18] sm:$0xff] }
  0xce   : > { %v1004_v53 = vmul.f32 0.0625, %v981_v37 }
  0xd0   : > { %v3350_v33 = vsub.f32 %v4161_v14, %v1004_v53 }
  0xd2   : > { %v984_v44 = vpop.xlane.xlu1 %983  ;;  %v1020_v46 = vmul.f32 %v3350_v33, %v3350_v33 }
  0xd3   : > { %v1005_v0 = vmul.f32 0.0625, %v984_v44 }
  0xd4   : > { %v1028_v38 = vsel %vm978_vm0, %v1020_v46, 0.0 }
  0xd5   : > { %v3357_v8 = vsub.f32 %v971_v27, %v1005_v0  ;;  %1029 = vadd.xlane.f32.xlu0 %v1028_v38 }
  0xd7   : > { %v1021_v1 = vmul.f32 %v3357_v8, %v3357_v8 }
  0xd8   : > { %v1151_v25 = vpop.xlane.xlu0 %1150 }
  0xd9   : > { %v1161_v3 = vmul.f32 0.0625, %v1151_v25  ;;  %v1031_v10 = vsel %vm978_vm0, %v1021_v1, 0.0 }
  0xda   : > { %1032 = vadd.xlane.f32.xlu1 %v1031_v10 }
  0xdb   : > { %v3364_v5 = vsub.f32 %v1129_v12, %v1161_v3 }
  0xdd   : > { %v1177_v6 = vmul.f32 %v3364_v5, %v3364_v5 }
  0xde   : > { %v1154_v58 = vpop.xlane.xlu1 %1153 }
  0xdf   : > { %v1162_v28 = vmul.f32 0.0625, %v1154_v58  ;;  %v1197_v27 = vsel %vm978_vm0, %v1177_v6, 0.0 }
  0xe0   : > { %1198 = vadd.xlane.f32.xlu0 %v1197_v27 }
  0xe1   : > { %v3371_v56 = vsub.f32 %v1130_v24, %v1162_v28 }
  0xe3   : > { %v1145_v18 = vpop.xlane.xlu0 %1144  ;;  %v1178_v62 = vmul.f32 %v3371_v56, %v3371_v56 }
  0xe4   : > { %v1159_v47 = vmul.f32 0.0625, %v1145_v18 }
  0xe5   : > { %v1200_v39 = vsel %vm978_vm0, %v1178_v62, 0.0 }
  0xe6   : > { %v3378_v12 = vsub.f32 %v1127_v31, %v1159_v47  ;;  %1201 = vadd.xlane.f32.xlu1 %v1200_v39  ;;  %v1148_v4 = vpop.xlane.xlu1 %1147  ;;  %v3440_v39 = vld [vmem:[%s4113_s3] ss:$0 sm:$0xff] }
  0xe7   : > { %v1160_v54 = vmul.f32 0.0625, %v1148_v4 }
  0xe8   : > { %v1175_v11 = vmul.f32 %v3378_v12, %v3378_v12 }
  0xe9   : > { %v3384_v22 = vsub.f32 %v1128_v36, %v1160_v54 }
  0xea   : > { %v1191_v24 = vsel %vm978_vm0, %v1175_v11, 0.0 }
  0xeb   : > { %1192 = vadd.xlane.f32.xlu0 %v1191_v24  ;;  %v1139_v40 = vpop.xlane.xlu0 %1138  ;;  %v1176_v48 = vmul.f32 %v3384_v22, %v3384_v22 }
  0xec   : > { %v1157_v20 = vmul.f32 0.0625, %v1139_v40 }
  0xed   : > { %v1194_v31 = vsel %vm978_vm0, %v1176_v48, 0.0  ;;  %v2327_v48 = vld [vmem:[%s4114_s4] ss:$0 sm:$0xff] }
  0xee   : > { %v3392_v50 = vsub.f32 %v1125_v15, %v1157_v20  ;;  %1195 = vadd.xlane.f32.xlu1 %v1194_v31 }
  0xf0   : > { %v1142_v29 = vpop.xlane.xlu1 %1141  ;;  %v1173_v51 = vmul.f32 %v3392_v50, %v3392_v50 }
  0xf1   : > { %v1158_v36 = vmul.f32 0.0625, %v1142_v29 }
  0xf2   : > { %v1185_v19 = vsel %vm978_vm0, %v1173_v51, 0.0 }
  0xf3   : > { %v3399_v63 = vsub.f32 %v1126_v43, %v1158_v36  ;;  %1186 = vadd.xlane.f32.xlu0 %v1185_v19 }
  0xf5   : > { %v1174_v9 = vmul.f32 %v3399_v63, %v3399_v63 }
  0xf6   : > { %v1133_v16 = vpop.xlane.xlu0 %1132 }
  0xf7   : > { %v1155_v32 = vmul.f32 0.0625, %v1133_v16  ;;  %v1188_v15 = vsel %vm978_vm0, %v1174_v9, 0.0 }
  0xf8   : > { %1189 = vadd.xlane.f32.xlu1 %v1188_v15 }
  0xf9   : > { %v3406_v26 = vsub.f32 %v1123_v17, %v1155_v32  ;;  %v2656_v17 = vmov 0.0  }
  0xfa   : > { %2400 = vmatprep.subr.bf16.mxu0 %v2656_v17  ;;  %2412 = vmatprep.subr.bf16.mxu1 %v2656_v17 }
  0xfb   : > { %v1136_v7 = vpop.xlane.xlu1 %1135  ;;  %v1171_v61 = vmul.f32 %v3406_v26, %v3406_v26  ;;  %2408 = vmatprep.mubr.msk.bf16.mxu0 %vm2657_vm1, %v2656_v17  ;;  %2420 = vmatprep.mubr.msk.bf16.mxu1 %vm2657_vm1, %v2656_v17 }
  0xfc   : > { %v1156_v35 = vmul.f32 0.0625, %v1136_v7 }
  0xfd   : > { %v1179_v43 = vsel %vm978_vm0, %v1171_v61, 0.0 }
  0xfe   : > { %v3413_v30 = vsub.f32 %v1124_v49, %v1156_v35  ;;  %1180 = vadd.xlane.f32.xlu0 %v1179_v43  ;;  %v1419_v49 = vld [vmem:[%s4116_s6 + $0x8] sm:$0xff] }
 0x100   : > { %v1172_v57 = vmul.f32 %v3413_v30, %v3413_v30 }
 0x102   : > { %v1182_v21 = vsel %vm978_vm0, %v1172_v57, 0.0 }
 0x103   : > { %1183 = vadd.xlane.f32.xlu1 %v1182_v21 }
 0x114   : > { %1422 = vperm.xlu0 %2500, %v1418_v34   ;;  %1427 = vperm.xlu1 %2501, %v1419_v49  }
 0x118   : > { %1505 = vperm.xlu1 %2501, %v2338_v45  }
 0x11c   : > { %1510 = vperm.xlu1 %2501, %v2339_v23  }
 0x144   : > { %v1048_v37 = vpop.xlane.xlu0 %1047 }
 0x145   : > { %v1058_v53 = vmul.f32 0.0625, %v1048_v37 }
 0x147   : > { %v1066_v60 = vadd.f32 1e-05, %v1058_v53 }
 0x148   : > { %v1051_v14 = vpop.xlane.xlu1 %1050 }
 0x149   : > { %2506 = vrsqrt.f32 %v1066_v60  ;;  %v1059_v44 = vmul.f32 0.0625, %v1051_v14 }
 0x14a   : > { %v1042_v46 = vpop.xlane.xlu0 %1041 }
 0x14b   : > { %v1056_v0 = vmul.f32 0.0625, %v1042_v46  ;;  %v1067_v38 = vadd.f32 1e-05, %v1059_v44 }
 0x14d   : > { %v1064_v1 = vadd.f32 1e-05, %v1056_v0  ;;  %2508 = vrsqrt.f32 %v1067_v38 }
 0x14e   : > { %v1045_v25 = vpop.xlane.xlu1 %1044 }
 0x14f   : > { %2510 = vrsqrt.f32 %v1064_v1  ;;  %v1057_v3 = vmul.f32 0.0625, %v1045_v25 }
 0x151   : > { %v1065_v10 = vadd.f32 1e-05, %v1057_v3  ;;  %v1036_v6 = vpop.xlane.xlu0 %1035 }
 0x152   : > { %v1054_v58 = vmul.f32 0.0625, %v1036_v6 }
 0x153   : > { %2512 = vrsqrt.f32 %v1065_v10 }
 0x154   : > { %v1062_v28 = vadd.f32 1e-05, %v1054_v58 }
 0x156   : > { %v2507_v27 = vpop.eup %2506  ;;  %2514 = vrsqrt.f32 %v1062_v28  ;;  %v1039_v18 = vpop.xlane.xlu1 %1038 }
 0x157   : > { %v1055_v62 = vmul.f32 0.0625, %v1039_v18  ;;  %v1082_v47 = vmul.f32 %v2507_v27, %v3308_v2 }
 0x159   : > { %v1063_v4 = vadd.f32 1e-05, %v1055_v62  ;;  %v1095_v40 = vmul.f32 %v3440_v39, %v1082_v47 }
 0x15a   : > { %v2509_v54 = vpop.eup %2508 }
 0x15b   : > { %2516 = vrsqrt.f32 %v1063_v4  ;;  %v1083_v24 = vmul.f32 %v2509_v54, %v3314_v59  ;;  %v1108_v36 = vadd.f32 %v2327_v48, %v1095_v40 }
 0x15c   : > { %v2511_v11 = vpop.eup %2510 }
 0x15d   : > { %v1096_v20 = vmul.f32 %v3440_v39, %v1083_v24  ;;  %v1080_v2 = vmul.f32 %v2511_v11, %v3319_v13 }
 0x15e   : > { %v1030_v31 = vpop.xlane.xlu0 %1029 }
 0x15f   : > { %v1052_v51 = vmul.f32 0.0625, %v1030_v31  ;;  %v1109_v19 = vadd.f32 %v2327_v48, %v1096_v20  ;;  %v1093_v59 = vmul.f32 %v3440_v39, %v1080_v2 }
 0x160   : > { %v2513_v29 = vpop.eup %2512 }
 0x161   : > { %v1081_v16 = vmul.f32 %v2513_v29, %v3328_v42  ;;  %v1060_v9 = vadd.f32 1e-05, %v1052_v51  ;;  %v1417_v32 = vpack.c.bf16 %v1109_v19, %v1108_v36  ;;  %v1106_v57 = vadd.f32 %v2327_v48, %v1093_v59  ;;  %v2329_v29 = vld [vmem:[%s4113_s3 + $0x1] ss:$0 sm:$0xff] }
 0x163   : > { %v1094_v15 = vmul.f32 %v3440_v39, %v1081_v16  ;;  %v2515_v7 = vpop.eup %2514  ;;  %2518 = vrsqrt.f32 %v1060_v9  ;;  %v1033_v61 = vpop.xlane.xlu1 %1032  ;;  %v1448_v35 = vsel %vm978_vm0, %v1417_v32, 0  ;;  %v2330_v9 = vld [vmem:[%s4114_s4 + $0x1] ss:$0 sm:$0xff] }
 0x164   : > { %v1053_v43 = vmul.f32 0.0625, %v1033_v61  ;;  %2401 = vmatpush3.bf16.xpose.msra.mxu0 %v1448_v35  ;;  %v1078_v21 = vmul.f32 %v2515_v7, %v3335_v52 }
 0x165   : > { %v1107_v13 = vadd.f32 %v2327_v48, %v1094_v15  ;;  %2402 = vmatprep.subr.bf16.mxu0 %v2656_v17 }
 0x166   : > { %v1061_v42 = vadd.f32 1e-05, %v1053_v43  ;;  %v1091_v23 = vmul.f32 %v3440_v39, %v1078_v21 }
 0x167   : > { %v1416_v34 = vpack.c.bf16 %v1107_v13, %v1106_v57 }
 0x168   : > { %v2517_v49 = vpop.eup %2516  ;;  %2520 = vrsqrt.f32 %v1061_v42  ;;  %v1104_v44 = vadd.f32 %v2327_v48, %v1091_v23 }
 0x169   : > { %v1199_v41 = vpop.xlane.xlu0 %1198  ;;  %v1079_v45 = vmul.f32 %v2517_v49, %v3343_v55  ;;  %v1445_v53 = vsel %vm978_vm0, %v1416_v34, 0 }
 0x16a   : > { %v1209_v37 = vmul.f32 0.0625, %v1199_v41 }
 0x16b   : > { %v1092_v60 = vmul.f32 %v3440_v39, %v1079_v45 }
 0x16c   : > { %v1217_v14 = vadd.f32 1e-05, %v1209_v37  ;;  %2403 = vmatpush3.bf16.xpose.msra.mxu0 %v1445_v53 }
 0x16d   : > { %2404 = vmatprep.subr.bf16.mxu0 %v2656_v17  ;;  %v1105_v52 = vadd.f32 %v2327_v48, %v1092_v60 }
 0x16e   : > { %2522 = vrsqrt.f32 %v1217_v14 }
 0x16f   : > { %v1202_v46 = vpop.xlane.xlu1 %1201  ;;  %v1415_v0 = vpack.c.bf16 %v1105_v52, %v1104_v44 }
 0x170   : > { %v2519_v38 = vpop.eup %2518  ;;  %v1210_v1 = vmul.f32 0.0625, %v1202_v46 }
 0x171   : > { %v1076_v55 = vmul.f32 %v2519_v38, %v3350_v33  ;;  %v1442_v3 = vsel %vm978_vm0, %v1415_v0, 0 }
 0x172   : > { %v1218_v25 = vadd.f32 1e-05, %v1210_v1 }
 0x173   : > { %v1089_v27 = vmul.f32 %v3440_v39, %v1076_v55 }
 0x174   : > { %2524 = vrsqrt.f32 %v1218_v25  ;;  %v1193_v10 = vpop.xlane.xlu0 %1192  ;;  %2405 = vmatpush3.bf16.xpose.msra.mxu0 %v1442_v3 }
 0x175   : > { %v2521_v6 = vpop.eup %2520  ;;  %v1207_v58 = vmul.f32 0.0625, %v1193_v10  ;;  %2406 = vmatprep.subr.bf16.mxu0 %v2656_v17  ;;  %v1102_v33 = vadd.f32 %v2327_v48, %v1089_v27 }
 0x176   : > { %v1077_v28 = vmul.f32 %v2521_v6, %v3357_v8 }
 0x177   : > { %v1215_v18 = vadd.f32 1e-05, %v1207_v58  ;;  %v1196_v62 = vpop.xlane.xlu1 %1195 }
 0x178   : > { %v1090_v47 = vmul.f32 %v3440_v39, %v1077_v28  ;;  %v1208_v4 = vmul.f32 0.0625, %v1196_v62 }
 0x179   : > { %2526 = vrsqrt.f32 %v1215_v18 }
 0x17a   : > { %v1103_v54 = vadd.f32 %v2327_v48, %v1090_v47  ;;  %v1216_v24 = vadd.f32 1e-05, %v1208_v4  ;;  %v4162_v4 = vld [vmem:[#allocation2_spill] sm:$0xff] }
 0x17b   : > { %v2523_v11 = vpop.eup %2522 }
 0x17c   : > { %v1414_v40 = vpack.c.bf16 %v1103_v54, %v1102_v33  ;;  %2528 = vrsqrt.f32 %v1216_v24  ;;  %v1187_v20 = vpop.xlane.xlu0 %1186  ;;  %v1233_v31 = vmul.f32 %v2523_v11, %v3364_v5  ;;  %v2502_v5 = vld [vmem:[%s4115_s5] sm:$0xff]   ;;  %v4163_v54 = vld [vmem:[#allocation3_spill] sm:$0xff] }
 0x17d   : > { %v1205_v2 = vmul.f32 0.0625, %v1187_v20  ;;  %v3509_v24 = vld [vmem:[%s2738_s20 + $0x60] sm:$0xff] }
 0x17e   : > { %v1439_v8 = vsel %vm978_vm0, %v1414_v40, 0  ;;  %v1246_v19 = vmul.f32 %v2329_v29, %v1233_v31  ;;  %v3514_v20 = vld [vmem:[%s2738_s20 + $0x61] sm:$0xff]  ;;  %v4164_v31 = vld [vmem:[#allocation4_spill] sm:$0xff] }
 0x17f   : > { %2407 = vmatpush3.bf16.xpose.msra.mxu0 %v1439_v8  ;;  %v1213_v39 = vadd.f32 1e-05, %v1205_v2 }
 0x180   : > { %2424 = vmatprep.subr.bf16.mxu0 %v2656_v17  ;;  %v1259_v7 = vadd.f32 %v2330_v9, %v1246_v19  ;;  %v3533_v19 = vld [vmem:[%s2738_s20 + $0x70] sm:$0xff] }
 0x181   : > { %v2525_v51 = vpop.eup %2524  ;;  %2530 = vrsqrt.f32 %v1213_v39  ;;  %v1190_v48 = vpop.xlane.xlu1 %1189 }
 0x182   : > { %v1234_v36 = vmul.f32 %v2525_v51, %v3371_v56  ;;  %v1206_v16 = vmul.f32 0.0625, %v1190_v48  ;;  %v3525_v51 = vld [vmem:[%s2738_s20 + $0x62] sm:$0xff] }
 0x184   : > { %v1247_v32 = vmul.f32 %v2329_v29, %v1234_v36  ;;  %v1214_v59 = vadd.f32 1e-05, %v1206_v16  ;;  %v3538_v16 = vld [vmem:[%s2738_s20 + $0x71] sm:$0xff] }
 0x186   : > { %v2527_v15 = vpop.eup %2526  ;;  %v1260_v61 = vadd.f32 %v2330_v9, %v1247_v32  ;;  %2409 = vmatmul.mubr.msk.bf16.vlgmr.msra.gmra.mxu0 %vm978_vm0, %v2502_v5  ;;  %2532 = vrsqrt.f32 %v1214_v59  ;;  %v3543_v32 = vld [vmem:[%s2738_s20 + $0x40] sm:$0xff] }
 0x187   : > { %v1181_v35 = vpop.xlane.xlu0 %1180  ;;  %v1231_v56 = vmul.f32 %v2527_v15, %v3378_v12  ;;  %2432 = vmatprep.mubr.msk.bf16.mxu0 %vm2657_vm1, %v2656_v17  ;;  %v3548_v15 = vld [vmem:[%s2738_s20 + $0x41] sm:$0xff] }
 0x188   : > { %v1203_v43 = vmul.f32 0.0625, %v1181_v35  ;;  %v1499_v13 = vpack.c.bf16 %v1260_v61, %v1259_v7 }
 0x189   : > { %v2529_v57 = vpop.eup %2528  ;;  %v1244_v49 = vmul.f32 %v2329_v29, %v1231_v56 }
 0x18a   : > { %v1211_v21 = vadd.f32 1e-05, %v1203_v43  ;;  %v1531_v42 = vsel %vm978_vm0, %v1499_v13, 0  ;;  %v1232_v34 = vmul.f32 %v2529_v57, %v3384_v22  ;;  %v3558_v13 = vld [vmem:[%s2738_s20 + $0x72] sm:$0xff] }
 0x18b   : > { %2413 = vmatpush3.bf16.xpose.msra.mxu1 %v1531_v42  ;;  %v1257_v53 = vadd.f32 %v2330_v9, %v1244_v49 }
 0x18c   : > { %2534 = vrsqrt.f32 %v1211_v21  ;;  %v1184_v41 = vpop.xlane.xlu1 %1183  ;;  %2414 = vmatprep.subr.bf16.mxu1 %v2656_v17  ;;  %v1245_v23 = vmul.f32 %v2329_v29, %v1232_v34  ;;  %v342_v21 = vld [vmem:[%s4111_s1 + $0x20] sm:$0x7] }
 0x18d   : > { %v1204_v45 = vmul.f32 0.0625, %v1184_v41  ;;  %v3566_v34 = vld [vmem:[%s2738_s20 + $0x42] sm:$0xff]  ;;  %v3571_v41 = vld [vmem:[%s2738_s20 + $0x50] sm:$0xff] }
 0x18e   : > { %v2531_v12 = vpop.eup %2530  ;;  %v1258_v60 = vadd.f32 %v2330_v9, %v1245_v23  ;;  %v3576_v23 = vld [vmem:[%s2738_s20 + $0x51] sm:$0xff] }
 0x18f   : > { %v1212_v37 = vadd.f32 1e-05, %v1204_v45  ;;  %v1229_v44 = vmul.f32 %v2531_v12, %v3392_v50 }
 0x190   : > { %v1498_v14 = vpack.c.bf16 %v1258_v60, %v1257_v53  ;;  %v2630_v60 = vld [vmem:[%s2738_s20 + $0x1] sm:$0xff] }
 0x191   : > { %2536 = vrsqrt.f32 %v1212_v37  ;;  %v1242_v0 = vmul.f32 %v2329_v29, %v1229_v44  ;;  %v2629_v37 = vld [vmem:[%s2738_s20] sm:$0xff] }
 0x192   : > { %v1528_v52 = vsel %vm978_vm0, %v1498_v14, 0 }
 0x193   : > { %v2533_v46 = vpop.eup %2532  ;;  %2415 = vmatpush3.bf16.xpose.msra.mxu1 %v1528_v52  ;;  %v1255_v25 = vadd.f32 %v2330_v9, %v1242_v0  ;;  %v3593_v0 = vrot.slane %v342_v21, %v4163_v54 }
 0x194   : > { %2416 = vmatprep.subr.bf16.mxu1 %v2656_v17  ;;  %v1230_v22 = vmul.f32 %v2533_v46, %v3399_v63 }
 0x196   : > { %v1243_v38 = vmul.f32 %v2329_v29, %v1230_v22  ;;  %v3590_v22 = vrot.slane %v342_v21, %v4162_v4 }
 0x198   : > { %v1256_v55 = vadd.f32 %v2330_v9, %v1243_v38 }
 0x199   : > { %v2535_v1 = vpop.eup %2534 }
 0x19a   : > { %v1497_v3 = vpack.c.bf16 %v1256_v55, %v1255_v25  ;;  %v1227_v10 = vmul.f32 %v2535_v1, %v3406_v26  ;;  %v2503_v26 = vld [vmem:[%s4115_s5 + $0x8] sm:$0xff]   ;;  %v2631_v1 = vld [vmem:[%s2738_s20 + $0x80] sm:$0xff] }
 0x19c   : > { %v1525_v6 = vsel %vm978_vm0, %v1497_v3, 0  ;;  %v1240_v28 = vmul.f32 %v2329_v29, %v1227_v10 }
 0x19d   : > { %2417 = vmatpush3.bf16.xpose.msra.mxu1 %v1525_v6  ;;  %v3600_v6 = vld [vmem:[%s2738_s20 + $0x52] sm:$0xff] }
 0x19e   : > { %v2537_v58 = vpop.eup %2536  ;;  %2418 = vmatprep.subr.bf16.mxu1 %v2656_v17  ;;  %v1253_v27 = vadd.f32 %v2330_v9, %v1240_v28 }
 0x19f   : > { %v1228_v50 = vmul.f32 %v2537_v58, %v3413_v30  ;;  %v340_v30 = vld [vmem:[%s4111_s1 + $0x18] sm:$0x7] }
 0x1a0   : > { %v3503_v33 = vrot.slane %v340_v30, %v4162_v4  ;;  %v3506_v11 = vrot.slane %v340_v30, %v4163_v54  ;;  %v3519_v8 = vrot.slane %v340_v30, %v4164_v31 }
 0x1a1   : > { %v1241_v63 = vmul.f32 %v2329_v29, %v1228_v50  ;;  %v341_v29 = vld [vmem:[%s4111_s1 + $0x1c] sm:$0x7]  ;;  %v3605_v50 = vld [vmem:[%s2738_s20 + $0x20] sm:$0xff] }
 0x1a2   : > { %v401_v40 = vmul.f32 %v3509_v24, %v3503_v33  ;;  %v469_v2 = vmul.f32 %v3514_v20, %v3506_v11  ;;  %v537_v48 = vmul.f32 %v3525_v51, %v3519_v8  ;;  %v3530_v36 = vrot.slane %v341_v29, %v4162_v4 }
 0x1a3   : > { %v1254_v18 = vadd.f32 %v2330_v9, %v1241_v63  ;;  %v402_v5 = vmul.f32 %v3533_v19, %v3503_v33  ;;  %v470_v9 = vmul.f32 %v3538_v16, %v3506_v11  ;;  %v399_v59 = vmul.f32 %v3543_v32, %v3503_v33  ;;  %v3610_v63 = vld [vmem:[%s2738_s20 + $0x21] sm:$0xff] }
 0x1a4   : > { %v477_v39 = vadd.f32 %v469_v2, %v401_v40  ;;  %v467_v7 = vmul.f32 %v3548_v15, %v3506_v11  ;;  %v606_v35 = vmul.f32 %v3533_v19, %v3530_v36  ;;  %v3555_v56 = vrot.slane %v341_v29, %v4163_v54  ;;  %v2636_v40 = vld [vmem:[%s2738_s20 + $0x81] sm:$0xff] }
 0x1a5   : > { %v1496_v62 = vpack.c.bf16 %v1254_v18, %v1253_v27  ;;  %v478_v43 = vadd.f32 %v470_v9, %v402_v5  ;;  %v538_v57 = vmul.f32 %v3558_v13, %v3519_v8  ;;  %v535_v49 = vmul.f32 %v3566_v34, %v3519_v8 }
 0x1a6   : > { %v545_v61 = vadd.f32 %v537_v48, %v477_v39  ;;  %v475_v42 = vadd.f32 %v467_v7, %v399_v59  ;;  %v400_v45 = vmul.f32 %v3571_v41, %v3503_v33  ;;  %v468_v12 = vmul.f32 %v3576_v23, %v3506_v11  ;;  %v1423_v59 = vpop.permute.xlu0 %1422 }
 0x1a7   : > { %v1522_v47 = vsel %vm978_vm0, %v1496_v62, 0  ;;  %v395_v53 = vmul.f32 %v2629_v37, %v3503_v33  ;;  %v463_v14 = vmul.f32 %v2630_v60, %v3506_v11  ;;  %v674_v52 = vmul.f32 %v3538_v16, %v3555_v56  ;;  %v2635_v62 = vld [vmem:[%s2738_s20 + $0x2] sm:$0xff] }
 0x1a8   : > { %2419 = vmatpush3.bf16.xpose.msra.mxu1 %v1522_v47  ;;  %v614_v44 = vadd.f32 %v606_v35, %v545_v61  ;;  %v3587_v46 = vrot.slane %v341_v29, %v4164_v31  ;;  %v546_v38 = vadd.f32 %v538_v57, %v478_v43  ;;  %v607_v25 = vmul.f32 %v2631_v1, %v3530_v36  ;;  %v3632_v61 = vld [vmem:[%s2738_s20 + $0x22] sm:$0xff]  ;;  %v2638_v57 = vld [vmem:[%s2738_s20 + $0x10] sm:$0xff] }
 0x1a9   : > { %v543_v55 = vadd.f32 %v535_v49, %v475_v42  ;;  %v604_v3 = vmul.f32 %v3571_v41, %v3530_v36  ;;  %v476_v10 = vadd.f32 %v468_v12, %v400_v45  ;;  %v536_v58 = vmul.f32 %v3600_v6, %v3519_v8  ;;  %v2639_v49 = vld [vmem:[%s2738_s20 + $0x82] sm:$0xff]  ;;  %v3641_v12 = vld [vmem:[%s2738_s20 + $0x30] sm:$0xff] }
 0x1aa   : > { %v397_v28 = vmul.f32 %v3605_v50, %v3503_v33  ;;  %v465_v27 = vmul.f32 %v3610_v63, %v3506_v11  ;;  %v471_v18 = vadd.f32 %v463_v14, %v395_v53  ;;  %v531_v47 = vmul.f32 %v2635_v62, %v3519_v8  ;;  %v3646_v53 = vld [vmem:[%s2738_s20 + $0x31] sm:$0xff] }
 0x1ab   : > { %v742_v30 = vmul.f32 %v3558_v13, %v3587_v46  ;;  %v3619_v4 = vrot.slane %v342_v21, %v4164_v31  ;;  %v811_v54 = vmul.f32 %v2631_v1, %v3590_v22  ;;  %v3624_v2 = vmul.f32 %v2636_v40, %v3593_v0 }
 0x1ac   : > { %v615_v29 = vadd.f32 %v607_v25, %v546_v38  ;;  %v675_v39 = vmul.f32 %v2636_v40, %v3555_v56  ;;  %v612_v48 = vadd.f32 %v604_v3, %v543_v55  ;;  %v672_v5 = vmul.f32 %v3576_v23, %v3555_v56 }
 0x1ad   : > { %v544_v9 = vadd.f32 %v536_v58, %v476_v10  ;;  %v605_v31 = vmul.f32 %v3509_v24, %v3530_v36  ;;  %v473_v7 = vadd.f32 %v465_v27, %v397_v28  ;;  %v533_v35 = vmul.f32 %v3632_v61, %v3519_v8  ;;  %v1428_v27 = vpop.permute.xlu1 %1427 }
 0x1ae   : > { %v539_v43 = vadd.f32 %v531_v47, %v471_v18  ;;  %v600_v21 = vmul.f32 %v2638_v57, %v3530_v36  ;;  %v743_v45 = vmul.f32 %v2639_v49, %v3587_v46  ;;  %v398_v37 = vmul.f32 %v3641_v12, %v3503_v33  ;;  %v2643_v47 = vld [vmem:[%s2738_s20 + $0x11] sm:$0xff] }
 0x1af   : > { %2421 = vmatmul.mubr.msk.bf16.vlgmr.msra.gmra.mxu1 %vm978_vm0, %v2503_v26  ;;  %v682_v26 = vadd.f32 %v674_v52, %v614_v44  ;;  %v466_v60 = vmul.f32 %v3646_v53, %v3506_v11  ;;  %v683_v44 = vadd.f32 %v675_v39, %v615_v29  ;;  %v2642_v52 = vld [vmem:[%s2738_s20 + $0x90] sm:$0xff]  ;;  %v740_v1 = vmul.f32 %v3600_v6, %v3587_v46 }
 0x1b0   : > { %v812_v38 = vmul.f32 %v2642_v52, %v3590_v22  ;;  %v673_v25 = vmul.f32 %v3514_v20, %v3555_v56  ;;  %v680_v3 = vadd.f32 %v672_v5, %v612_v48  ;;  %v613_v10 = vadd.f32 %v605_v31, %v544_v9 }
 0x1b1   : > { %v750_v42 = vadd.f32 %v742_v30, %v682_v26  ;;  %v602_v58 = vmul.f32 %v3641_v12, %v3530_v36  ;;  %v541_v18 = vadd.f32 %v533_v35, %v473_v7  ;;  %v608_v62 = vadd.f32 %v600_v21, %v539_v43  ;;  %v3661_v30 = vld [vmem:[%s2738_s20 + $0x32] sm:$0xff] }
 0x1b2   : > { %v668_v26 = vmul.f32 %v2643_v47, %v3555_v56  ;;  %v534_v40 = vmul.f32 %v3661_v30, %v3519_v8  ;;  %v474_v39 = vadd.f32 %v466_v60, %v398_v37  ;;  %v396_v48 = vmul.f32 %v2638_v57, %v3503_v33  ;;  %v2645_v60 = vld [vmem:[%s2738_s20 + $0x12] sm:$0xff] }
 0x1b3   : > { %v464_v5 = vmul.f32 %v2643_v47, %v3506_v11  ;;  %v819_v31 = vadd.f32 %v811_v54, %v750_v42  ;;  %v809_v7 = vmul.f32 %v3509_v24, %v3590_v22  ;;  %v741_v35 = vmul.f32 %v3525_v51, %v3587_v46 }
 0x1b4   : > { %v748_v21 = vadd.f32 %v740_v1, %v680_v3  ;;  %v670_v37 = vmul.f32 %v3646_v53, %v3555_v56  ;;  %v610_v57 = vadd.f32 %v602_v58, %v541_v18  ;;  %v676_v11 = vadd.f32 %v668_v26, %v608_v62 }
 0x1b5   : > { %v736_v54 = vmul.f32 %v2645_v60, %v3587_v46  ;;  %v603_v24 = vmul.f32 %v3543_v32, %v3530_v36  ;;  %v532_v52 = vmul.f32 %v2645_v60, %v3519_v8  ;;  %v887_v1 = vadd.f32 %v3624_v2, %v819_v31 }
 0x1b6   : > { %v738_v8 = vmul.f32 %v3661_v30, %v3587_v46  ;;  %v678_v2 = vadd.f32 %v670_v37, %v610_v57  ;;  %v671_v62 = vmul.f32 %v3548_v15, %v3555_v56  ;;  %v878_v31 = vmul.f32 %v3538_v16, %v3593_v0 }
 0x1b7   : > { %v744_v47 = vadd.f32 %v736_v54, %v676_v11  ;;  %v875_v57 = vmul.f32 %v3548_v15, %v3593_v0  ;;  %v941_v54 = vmul.f32 %v3632_v61, %v3619_v4  ;;  %v943_v15 = vmul.f32 %v3566_v34, %v3619_v4 }
 0x246   : > { %v1484_v14 = vpop.f32.mrf.mxu0 }
 0x247   : > { %v1485_v55 = vadd.f32 %v1484_v14, %v1423_v59  ;;  %v751_v59 = vadd.f32 %v743_v45, %v683_v44  ;;  %v681_v14 = vadd.f32 %v673_v25, %v613_v10  ;;  %v542_v45 = vadd.f32 %v534_v40, %v474_v39 }
 0x248   : > { %v2410_v28 = vpop.f32.mrf.mxu0  ;;  %v472_v44 = vadd.f32 %v464_v5, %v396_v48  ;;  %v947_v25 = vmul.f32 %v2639_v49, %v3619_v4  ;;  %v877_v10 = vmul.f32 %v3514_v20, %v3593_v0  ;;  %v805_v49 = vmul.f32 %v3605_v50, %v3590_v22  ;;  %v3701_v48 = vld [vmem:[%s4112_s2 + $0x2] ss:$0 sm:$0xff] }
 0x249   : > { %v1491_v29 = vpack.c.bf16 %v1485_v55, %v1485_v55  ;;  %v2646_v55 = vld [vmem:[%s2738_s20 + $0x91] sm:$0xff]  ;;  %v820_v58 = vadd.f32 %v812_v38, %v751_v59  ;;  %v817_v28 = vadd.f32 %v809_v7, %v748_v21  ;;  %v749_v18 = vadd.f32 %v741_v35, %v681_v14 }
 0x24a   : > { %v1487_v9 = vpop.f32.mrf.mxu0  ;;  %v880_v3 = vmul.f32 %v2646_v55, %v3593_v0  ;;  %v611_v26 = vadd.f32 %v603_v24, %v542_v45  ;;  %v540_v20 = vadd.f32 %v532_v52, %v472_v44  ;;  %v601_v38 = vmul.f32 %v3605_v50, %v3530_v36 }
 0x24b   : > { %v1488_v43 = vadd.f32 %v1487_v9, %v1428_v27  ;;  %1659 = vxpose.xlu1.c.b16.start.end [1/1] (short) (narrow) %v1491_v29, 64  ;;  %v810_v27 = vmul.f32 %v3533_v19, %v3590_v22  ;;  %v955_v40 = vadd.f32 %v947_v25, %v887_v1  ;;  %v2647_v29 = vld [vmem:[%s2738_s20 + $0x92] sm:$0xff]  ;;  %v945_v39 = vmul.f32 %v3525_v51, %v3619_v4  ;;  %s332_s20 = scalar_lea.vmem %s4119_s9, %s2362_s19 }
 0x24c   : > { %v2411_v33 = vpop.f32.mrf.mxu0  ;;  %v948_v19 = vmul.f32 %v2647_v29, %v3619_v4  ;;  %v888_v5 = vadd.f32 %v880_v3, %v820_v58  ;;  %v885_v9 = vadd.f32 %v877_v10, %v817_v28  ;;  %v807_v36 = vmul.f32 %v3543_v32, %v3590_v22 }
 0x24d   : > { %v1492_v42 = vpack.c.bf16 %v1488_v43, %v1488_v43  ;;  %v818_v50 = vadd.f32 %v810_v27, %v749_v18  ;;  %v746_v59 = vadd.f32 %v738_v8, %v678_v2  ;;  %v873_v7 = vmul.f32 %v3610_v63, %v3593_v0 }
 0x24e   : > { %v739_v51 = vmul.f32 %v3566_v34, %v3587_v46  ;;  %v813_v35 = vadd.f32 %v805_v49, %v744_v47  ;;  %v679_v43 = vadd.f32 %v671_v62, %v611_v26  ;;  %v609_v21 = vadd.f32 %v601_v38, %v540_v20 }
 0x24f   : > { %1757 = vxpose.xlu0.c.b16.start.end [1/1] (short) (narrow) %v1492_v42, 64  ;;  %v669_v14 = vmul.f32 %v3610_v63, %v3555_v56  ;;  %v3714_v37 = vadd.f32 %v3701_v48, %v955_v40  ;;  %v956_v16 = vadd.f32 %v948_v19, %v888_v5  ;;  %v953_v33 = vadd.f32 %v945_v39, %v885_v9  ;;  %v1506_v39 = vpop.permute.xlu1 %1505 }
 0x250   : > { %v946_v32 = vmul.f32 %v3558_v13, %v3619_v4  ;;  %v886_v11 = vadd.f32 %v878_v31, %v818_v50  ;;  %v815_v60 = vadd.f32 %v807_v36, %v746_v59  ;;  %v808_v24 = vmul.f32 %v3571_v41, %v3590_v22 }
 0x251   : > { %v881_v56 = vadd.f32 %v873_v7, %v813_v35  ;;  %v747_v63 = vadd.f32 %v739_v51, %v679_v43  ;;  %v677_v42 = vadd.f32 %v669_v14, %v609_v21  ;;  %v737_v45 = vmul.f32 %v3632_v61, %v3587_v46 }
 0x252   : > { %v1280_v44 = vmax.f32 %v3714_v37, 0.0  ;;  %v3728_v13 = vadd.f32 %v3701_v48, %v956_v16  ;;  %v3733_v52 = vadd.f32 %v3701_v48, %v953_v33  ;;  %v954_v1 = vadd.f32 %v946_v32, %v886_v11 }
 0x253   : > { %v883_v25 = vadd.f32 %v875_v57, %v815_v60  ;;  %v876_v41 = vmul.f32 %v3576_v23, %v3593_v0  ;;  %v949_v55 = vadd.f32 %v941_v54, %v881_v56  ;;  %v816_v3 = vadd.f32 %v808_v24, %v747_v63  ;;  %v1511_v51 = vpop.permute.xlu1 %1510 }
 0x254   : > { %v745_v10 = vadd.f32 %v737_v45, %v677_v42  ;;  %v806_v46 = vmul.f32 %v3641_v12, %v3590_v22  ;;  %v1300_v61 = vsel %vm978_vm0, %v1280_v44, 0.0  ;;  %v1281_v34 = vmax.f32 %v3728_v13, 0.0 }
 0x255   : > { %v1278_v58 = vmax.f32 %v3733_v52, 0.0  ;;  %v3745_v28 = vadd.f32 %v3701_v48, %v954_v1  ;;  %v951_v27 = vadd.f32 %v943_v15, %v883_v25  ;;  %v944_v23 = vmul.f32 %v3600_v6, %v3619_v4 }
 0x256   : > { %v3750_v8 = vadd.f32 %v3701_v48, %v949_v55  ;;  %v884_v18 = vadd.f32 %v876_v41, %v816_v3  ;;  %v814_v22 = vadd.f32 %v806_v46, %v745_v10  ;;  %v874_v12 = vmul.f32 %v3646_v53, %v3593_v0 }
 0x257   : > { %v1303_v2 = vsel %vm978_vm0, %v1281_v34, 0.0  ;;  %v1294_v49 = vsel %vm978_vm0, %v1278_v58, 0.0  ;;  %v1279_v62 = vmax.f32 %v3745_v28, 0.0  ;;  %v3762_v6 = vadd.f32 %v3701_v48, %v951_v27 }
 0x258   : > { %v1274_v47 = vmax.f32 %v3750_v8, 0.0  ;;  %v952_v26 = vadd.f32 %v944_v23, %v884_v18  ;;  %v882_v20 = vadd.f32 %v874_v12, %v814_v22  ;;  %v942_v0 = vmul.f32 %v3661_v30, %v3619_v4 }
 0x259   : > { %v1297_v53 = vsel %vm978_vm0, %v1279_v62, 0.0  ;;  %v1276_v38 = vmax.f32 %v3762_v6, 0.0 }
 0x25a   : > { %v1282_v40 = vsel %vm978_vm0, %v1274_v47, 0.0  ;;  %v3775_v29 = vadd.f32 %v3701_v48, %v952_v26  ;;  %v950_v19 = vadd.f32 %v942_v0, %v882_v20 }
 0x25b   : > { %v1288_v4 = vsel %vm978_vm0, %v1276_v38, 0.0 }
 0x25c   : > { %v1277_v30 = vmax.f32 %v3775_v29, 0.0  ;;  %v3782_v5 = vadd.f32 %v3701_v48, %v950_v19 }
 0x25e   : > { %v1291_v50 = vsel %vm978_vm0, %v1277_v30, 0.0  ;;  %v1275_v59 = vmax.f32 %v3782_v5, 0.0 }
 0x260   : > { %v1285_v48 = vsel %vm978_vm0, %v1275_v59, 0.0 }
 0x264   : > { %1301 = vadd.xlane.f32.xlu1 %v1300_v61 }
 0x268   : > { %1304 = vadd.xlane.f32.xlu0 %v1303_v2  ;;  %1295 = vadd.xlane.f32.xlu1 %v1294_v49 }
 0x26c   : > { %1298 = vadd.xlane.f32.xlu1 %v1297_v53  ;;  %1283 = vadd.xlane.f32.xlu0 %v1282_v40 }
 0x26f   : > { %v1567_v9 = vpop.f32.mrf.mxu1 }
 0x270   : > { %v1568_v31 = vadd.f32 %v1567_v9, %v1506_v39  ;;  %1289 = vadd.xlane.f32.xlu1 %v1288_v4 }
 0x271   : > { %v2422_v36 = vpop.f32.mrf.mxu1 }
 0x272   : > { %v1574_v7 = vpack.c.bf16 %v1568_v31, %v1568_v31 }
 0x273   : > { %v1570_v35 = vpop.f32.mrf.mxu1 }
 0x274   : > { %v1690_v43 = vsel %vm1688_vm2, %v1574_v7, 0  ;;  %v1571_v21 = vadd.f32 %v1570_v35, %v1511_v51  ;;  %2486 = vmatprep.subr.msk.bf16.mxu1 %vm1688_vm2, %v1574_v7  ;;  %1292 = vadd.xlane.f32.xlu1 %v1291_v50 }
 0x275   : > { %2437 = vmatpush3.bf16.msra.mxu1 %v1690_v43  ;;  %v2423_v14 = vpop.f32.mrf.mxu1 }
 0x276   : > { %v1575_v16 = vpack.c.bf16 %v1571_v21, %v1571_v21 }
 0x278   : > { %2487 = vmatprep.subr.msk.bf16.mxu1 %vm1688_vm2, %v1575_v16  ;;  %1286 = vadd.xlane.f32.xlu1 %v1285_v48  ;;  %v1786_v57 = vsel %vm1688_vm2, %v1575_v16, 0 }
 0x2ad   : > { %v1667_v33 = vpop.trf.xlu1 }
 0x2ae   : > { %2438 = vmatprep.mubr.msk.bf16.mxu1 %vm1675_vm3, %v1667_v33 }
 0x2b1   : > { %v1668_v32 = vpop.trf.xlu1  ;;  %v1765_v11 = vpop.trf.xlu0 }
 0x2b2   : > { %2439 = vmatmul.mubr.msk.bf16.vlgmr.msra.gmra.mxu1 %vm1675_vm3, %v1668_v32 }
 0x2b3   : > { %2447 = vmatpush3.bf16.msra.mxu1 %v1786_v57 }
 0x2b4   : > { %2456 = vmatprep.subr.bf16.mxu1 %v2656_v17 }
 0x2b5   : > { %v1669_v60 = vpop.trf.xlu1  ;;  %v1766_v24 = vpop.trf.xlu0 }
 0x2b6   : > { %2442 = vmatprep.mubr.msk.bf16.mxu1 %vm1675_vm3, %v1669_v60 }
 0x2b9   : > { %v1670_v54 = vpop.trf.xlu1  ;;  %v1767_v56 = vpop.trf.xlu0 }
 0x2ba   : > { %2443 = vmatmul.mubr.msk.bf16.gmra.mxu1 %vm1675_vm3, %v1670_v54 }
 0x2bb   : > { %2448 = vmatprep.mubr.msk.bf16.mxu1 %vm1675_vm3, %v1765_v11 }
 0x2bd   : > { %v1768_v63 = vpop.trf.xlu0 }
 0x2c2   : > { %2449 = vmatmul.mubr.msk.bf16.vlgmr.msra.gmra.mxu1 %vm1675_vm3, %v1766_v24 }
 0x2c3   : > { %2452 = vmatprep.mubr.msk.bf16.mxu1 %vm1675_vm3, %v1767_v56 }
 0x2ca   : > { %2453 = vmatmul.mubr.msk.bf16.gmra.mxu1 %vm1675_vm3, %v1768_v63 }
 0x2cb   : > { %2464 = vmatprep.mubr.msk.bf16.mxu1 %vm2657_vm1, %v2656_v17 }
 0x2ed   : > { %v1302_v42 = vpop.xlane.xlu1 %1301 }
 0x2ee   : > { %v1312_v45 = vmul.f32 0.0625, %v1302_v42 }
 0x2f0   : > { %v3808_v15 = vsub.f32 %v1280_v44, %v1312_v45 }
 0x2f1   : > { %v1296_v1 = vpop.xlane.xlu1 %1295  ;;  %v1305_v25 = vpop.xlane.xlu0 %1304 }
 0x2f2   : > { %v1310_v41 = vmul.f32 0.0625, %v1296_v1  ;;  %v1313_v55 = vmul.f32 0.0625, %v1305_v25  ;;  %v1328_v3 = vmul.f32 %v3808_v15, %v3808_v15 }
 0x2f4   : > { %v3814_v10 = vsub.f32 %v1278_v58, %v1310_v41  ;;  %v3818_v46 = vsub.f32 %v1281_v34, %v1313_v55  ;;  %v1348_v61 = vsel %vm978_vm0, %v1328_v3, 0.0 }
 0x2f5   : > { %1349 = vadd.xlane.f32.xlu0 %v1348_v61  ;;  %v1299_v37 = vpop.xlane.xlu1 %1298  ;;  %v1284_v44 = vpop.xlane.xlu0 %1283 }
 0x2f6   : > { %v1311_v27 = vmul.f32 0.0625, %v1299_v37  ;;  %v1326_v23 = vmul.f32 %v3814_v10, %v3814_v10  ;;  %v1329_v18 = vmul.f32 %v3818_v46, %v3818_v46  ;;  %v1306_v22 = vmul.f32 0.0625, %v1284_v44 }
 0x2f8   : > { %v3827_v52 = vsub.f32 %v1279_v62, %v1311_v27  ;;  %v1342_v13 = vsel %vm978_vm0, %v1326_v23, 0.0  ;;  %v1351_v34 = vsel %vm978_vm0, %v1329_v18, 0.0  ;;  %v3835_v49 = vsub.f32 %v1274_v47, %v1306_v22 }
 0x2f9   : > { %1343 = vadd.xlane.f32.xlu0 %v1342_v13  ;;  %v1290_v58 = vpop.xlane.xlu1 %1289  ;;  %1352 = vadd.xlane.f32.xlu1 %v1351_v34 }
 0x2fa   : > { %v1308_v12 = vmul.f32 0.0625, %v1290_v58  ;;  %v1327_v2 = vmul.f32 %v3827_v52, %v3827_v52  ;;  %v1322_v53 = vmul.f32 %v3835_v49, %v3835_v49 }
 0x2fc   : > { %v3839_v28 = vsub.f32 %v1276_v38, %v1308_v12  ;;  %v1345_v62 = vsel %vm978_vm0, %v1327_v2, 0.0  ;;  %v1330_v19 = vsel %vm978_vm0, %v1322_v53, 0.0 }
 0x2fd   : > { %v1293_v26 = vpop.xlane.xlu1 %1292  ;;  %1346 = vadd.xlane.f32.xlu1 %v1345_v62 }
 0x2fe   : > { %v1309_v20 = vmul.f32 0.0625, %v1293_v26  ;;  %v1324_v0 = vmul.f32 %v3839_v28, %v3839_v28 }
 0x300   : > { %v3848_v8 = vsub.f32 %v1277_v30, %v1309_v20  ;;  %v1336_v47 = vsel %vm978_vm0, %v1324_v0, 0.0  ;;  %v3906_v20 = vld [vmem:[%s4113_s3 + $0x2] ss:$0 sm:$0xff] }
 0x301   : > { %1337 = vadd.xlane.f32.xlu0 %v1336_v47  ;;  %v1287_v6 = vpop.xlane.xlu1 %1286 }
 0x302   : > { %v1307_v38 = vmul.f32 0.0625, %v1287_v6  ;;  %v1325_v40 = vmul.f32 %v3848_v8, %v3848_v8 }
 0x304   : > { %v3856_v39 = vsub.f32 %v1275_v59, %v1307_v38  ;;  %v1339_v4 = vsel %vm978_vm0, %v1325_v40, 0.0 }
 0x305   : > { %1340 = vadd.xlane.f32.xlu1 %v1339_v4  ;;  %1331 = vadd.xlane.f32.xlu0 %v1330_v19 }
 0x306   : > { %v1323_v29 = vmul.f32 %v3856_v39, %v3856_v39 }
 0x308   : > { %v1333_v30 = vsel %vm978_vm0, %v1323_v29, 0.0 }
 0x309   : > { %1334 = vadd.xlane.f32.xlu1 %v1333_v30  ;;  %v2333_v30 = vld [vmem:[%s4114_s4 + $0x2] ss:$0 sm:$0xff] }
 0x372   : > { %v3862_v9 = vpop.f32.mrf.mxu1 }
 0x373   : > { %v1860_v29 = vsel %vm1853_vm4, %v3862_v9, -inf }
 0x374   : > { %v3864_v31 = vpop.f32.mrf.mxu1 }
 0x376   : > { %v3866_v36 = vpop.f32.mrf.mxu1 }
 0x378   : > { %v3868_v50 = vpop.f32.mrf.mxu1 }
 0x37a   : > { %v3870_v5 = vpop.f32.mrf.mxu1 }
 0x37b   : > { %v1872_v59 = vsel %vm1853_vm4, %v3870_v5, -inf }
 0x37c   : > { %v3874_v7 = vpop.f32.mrf.mxu1  ;;  %1873 = vmax.xlane.f32.xlu0 %v1872_v59 }
 0x37d   : > { %v1866_v13 = vsel %vm1853_vm4, %v3874_v7, -inf }
 0x37e   : > { %v3876_v51 = vpop.f32.mrf.mxu1  ;;  %v1350_v35 = vpop.xlane.xlu0 %1349 }
 0x37f   : > { %v1360_v43 = vmul.f32 0.0625, %v1350_v35  ;;  %v1875_v21 = vsel %vm1853_vm4, %v3876_v51, -inf }
 0x380   : > { %v3880_v48 = vpop.f32.mrf.mxu1  ;;  %1876 = vmax.xlane.f32.xlu1 %v1875_v21 }
 0x381   : > { %v1368_v14 = vadd.f32 1e-05, %v1360_v43  ;;  %v1869_v53 = vsel %vm1853_vm4, %v3880_v48, -inf }
 0x382   : > { %v3882_v16 = vpop.f32.mrf.mxu1  ;;  %v1353_v33 = vpop.xlane.xlu1 %1352 }
 0x383   : > { %2538 = vrsqrt.f32 %v1368_v14  ;;  %v1361_v32 = vmul.f32 0.0625, %v1353_v33  ;;  %v1344_v57 = vpop.xlane.xlu0 %1343 }
 0x384   : > { %v1358_v11 = vmul.f32 0.0625, %v1344_v57  ;;  %v3884_v60 = vpop.f32.mrf.mxu1  ;;  %v1884_v57 = vsel %vm1853_vm4, %v3882_v16, -inf }
 0x385   : > { %v1369_v54 = vadd.f32 1e-05, %v1361_v32  ;;  %v1863_v32 = vsel %vm1853_vm4, %v3866_v36, -inf }
 0x386   : > { %v1366_v24 = vadd.f32 1e-05, %v1358_v11  ;;  %v3886_v56 = vpop.f32.mrf.mxu1  ;;  %v1347_v63 = vpop.xlane.xlu1 %1346 }
 0x387   : > { %2540 = vrsqrt.f32 %v1369_v54  ;;  %v1359_v42 = vmul.f32 0.0625, %v1347_v63 }
 0x388   : > { %2542 = vrsqrt.f32 %v1366_v24  ;;  %v3888_v45 = vpop.f32.mrf.mxu1 }
 0x389   : > { %v1367_v1 = vadd.f32 1e-05, %v1359_v42 }
 0x38a   : > { %v3890_v25 = vpop.f32.mrf.mxu1  ;;  %v1338_v41 = vpop.xlane.xlu0 %1337 }
 0x38b   : > { %2544 = vrsqrt.f32 %v1367_v1  ;;  %v1356_v55 = vmul.f32 0.0625, %v1338_v41  ;;  %v1896_v3 = vsel %vm1853_vm4, %v3890_v25, -inf  ;;  %v1854_v1 = vsel %vm1853_vm4, %v3864_v31, -inf }
 0x38c   : > { %v3894_v61 = vpop.f32.mrf.mxu1  ;;  %1897 = vmax.xlane.f32.xlu0 %v1896_v3 }
 0x38d   : > { %v1364_v37 = vadd.f32 1e-05, %v1356_v55  ;;  %v1890_v47 = vsel %vm1853_vm4, %v3894_v61, -inf }
 0x38e   : > { %v3896_v44 = vpop.f32.mrf.mxu1  ;;  %v1341_v27 = vpop.xlane.xlu1 %1340 }
 0x38f   : > { %2546 = vrsqrt.f32 %v1364_v37  ;;  %v1357_v23 = vmul.f32 0.0625, %v1341_v27  ;;  %v1332_v18 = vpop.xlane.xlu0 %1331  ;;  %v1899_v22 = vsel %vm1853_vm4, %v3896_v44, -inf }
 0x390   : > { %v2539_v34 = vpop.eup %2538  ;;  %v1354_v58 = vmul.f32 0.0625, %v1332_v18  ;;  %1900 = vmax.xlane.f32.xlu1 %v1899_v22  ;;  %1867 = vmax.xlane.f32.xlu0 %v1866_v13  ;;  %v3912_v38 = vpop.f32.mrf.mxu1  ;;  %v1857_v18 = vsel %vm1853_vm4, %v3868_v50, -inf  ;;  %v1878_v22 = vsel %vm1853_vm4, %v3884_v60, -inf }
 0x391   : > { %v1365_v12 = vadd.f32 1e-05, %v1357_v23  ;;  %v1384_v2 = vmul.f32 %v2539_v34, %v3808_v15  ;;  %v1893_v59 = vsel %vm1853_vm4, %v3912_v38, -inf }
 0x392   : > { %v1362_v62 = vadd.f32 1e-05, %v1354_v58  ;;  %v1335_v26 = vpop.xlane.xlu1 %1334 }
 0x393   : > { %2548 = vrsqrt.f32 %v1365_v12  ;;  %v1355_v0 = vmul.f32 0.0625, %v1335_v26  ;;  %v1397_v4 = vmul.f32 %v3906_v20, %v1384_v2 }
 0x394   : > { %v2541_v6 = vpop.eup %2540  ;;  %1870 = vmax.xlane.f32.xlu1 %v1869_v53  ;;  %1891 = vmax.xlane.f32.xlu0 %v1890_v47  ;;  %2550 = vrsqrt.f32 %v1362_v62 }
 0x395   : > { %v2543_v15 = vpop.eup %2542  ;;  %v1363_v40 = vadd.f32 1e-05, %v1355_v0  ;;  %v1385_v19 = vmul.f32 %v2541_v6, %v3818_v46  ;;  %v1410_v46 = vadd.f32 %v2333_v30, %v1397_v4 }
 0x396   : > { %v1382_v43 = vmul.f32 %v2543_v15, %v3814_v10 }
 0x397   : > { %2552 = vrsqrt.f32 %v1363_v40  ;;  %v1398_v35 = vmul.f32 %v3906_v20, %v1385_v19 }
 0x398   : > { %v2545_v21 = vpop.eup %2544  ;;  %1894 = vmax.xlane.f32.xlu1 %v1893_v59  ;;  %1861 = vmax.xlane.f32.xlu0 %v1860_v29  ;;  %v1395_v54 = vmul.f32 %v3906_v20, %v1382_v43 }
 0x399   : > { %v1411_v14 = vadd.f32 %v2333_v30, %v1398_v35  ;;  %v1383_v33 = vmul.f32 %v2545_v21, %v3827_v52  ;;  %v1887_v52 = vsel %vm1853_vm4, %v3886_v56, -inf }
 0x39a   : > { %v1408_v41 = vadd.f32 %v2333_v30, %v1395_v54 }
 0x39b   : > { %v1582_v11 = vpack.c.bf16 %v1411_v14, %v1410_v46  ;;  %v1396_v24 = vmul.f32 %v3906_v20, %v1383_v33 }
 0x39c   : > { %v2547_v63 = vpop.eup %2546  ;;  %1864 = vmax.xlane.f32.xlu1 %v1863_v32  ;;  %1885 = vmax.xlane.f32.xlu0 %v1884_v57 }
 0x39d   : > { %v1614_v10 = vsel %vm978_vm0, %v1582_v11, 0  ;;  %v1409_v42 = vadd.f32 %v2333_v30, %v1396_v24  ;;  %v1380_v55 = vmul.f32 %v2547_v63, %v3839_v28 }
 0x39e   : > { %2425 = vmatpush3.bf16.xpose.msra.mxu0 %v1614_v10 }
 0x39f   : > { %2426 = vmatprep.subr.bf16.mxu0 %v2656_v17  ;;  %v1581_v37 = vpack.c.bf16 %v1409_v42, %v1408_v41  ;;  %v1393_v13 = vmul.f32 %v3906_v20, %v1380_v55 }
 0x3a0   : > { %v2549_v3 = vpop.eup %2548  ;;  %1888 = vmax.xlane.f32.xlu1 %v1887_v52  ;;  %1855 = vmax.xlane.f32.xlu0 %v1854_v1 }
 0x3a1   : > { %v1381_v27 = vmul.f32 %v2549_v3, %v3848_v8  ;;  %v2551_v23 = vpop.eup %2550  ;;  %v1611_v28 = vsel %vm978_vm0, %v1581_v37, 0  ;;  %v1881_v8 = vsel %vm1853_vm4, %v3888_v45, -inf  ;;  %v1406_v62 = vadd.f32 %v2333_v30, %v1393_v13 }
 0x3a2   : > { %v1378_v26 = vmul.f32 %v2551_v23, %v3835_v49  ;;  %v2504_v49 = vld [vmem:[%s4115_s5 + $0x10] sm:$0xff]  }
 0x3a3   : > { %v1394_v34 = vmul.f32 %v3906_v20, %v1381_v27 }
 0x3a4   : > { %v2553_v58 = vpop.eup %2552  ;;  %1858 = vmax.xlane.f32.xlu1 %v1857_v18  ;;  %1879 = vmax.xlane.f32.xlu0 %v1878_v22  ;;  %v1391_v47 = vmul.f32 %v3906_v20, %v1378_v26 }
 0x3a5   : > { %v1407_v12 = vadd.f32 %v2333_v30, %v1394_v34  ;;  %v1379_v2 = vmul.f32 %v2553_v58, %v3856_v39 }
 0x3a6   : > { %2427 = vmatpush3.bf16.xpose.msra.mxu0 %v1611_v28  ;;  %v1404_v39 = vadd.f32 %v2333_v30, %v1391_v47 }
 0x3a7   : > { %2428 = vmatprep.subr.bf16.mxu0 %v2656_v17  ;;  %v1580_v0 = vpack.c.bf16 %v1407_v12, %v1406_v62  ;;  %v1392_v53 = vmul.f32 %v3906_v20, %v1379_v2 }
 0x3a8   : > { %1882 = vmax.xlane.f32.xlu1 %v1881_v8 }
 0x3a9   : > { %v1608_v6 = vsel %vm978_vm0, %v1580_v0, 0  ;;  %v1405_v15 = vadd.f32 %v2333_v30, %v1392_v53 }
 0x3ab   : > { %v1579_v40 = vpack.c.bf16 %v1405_v15, %v1404_v39 }
 0x3ad   : > { %v1605_v19 = vsel %vm978_vm0, %v1579_v40, 0 }
 0x3ae   : > { %2429 = vmatpush3.bf16.xpose.msra.mxu0 %v1608_v6 }
 0x3af   : > { %2430 = vmatprep.subr.bf16.mxu0 %v2656_v17 }
 0x3b6   : > { %2431 = vmatpush3.bf16.xpose.msra.mxu0 %v1605_v19 }
 0x3b7   : > { %2468 = vmatprep.subr.bf16.mxu0 %v2656_v17 }
 0x3bd   : > { %2433 = vmatmul.mubr.msk.bf16.vlgmr.msra.gmra.mxu0 %vm978_vm0, %v2504_v49 }
 0x3be   : > { %2476 = vmatprep.mubr.msk.bf16.mxu0 %vm2657_vm1, %v2656_v17 }
 0x405   : > { %v1874_v20 = vpop.xlane.xlu0 %1873 }
 0x406   : > { %v1908_v4 = vsub.f32 %v3870_v5, %v1874_v20 }
 0x408   : > { %v1930_v29 = vmul.f32 1.442695, %v1908_v4 }
 0x409   : > { %v1877_v30 = vpop.xlane.xlu1 %1876 }
 0x40a   : > { %2554 = vpow2.f32 %v1930_v29  ;;  %v1909_v59 = vsub.f32 %v3876_v51, %v1877_v30 }
 0x40c   : > { %v1932_v35 = vmul.f32 1.442695, %v1909_v59 }
 0x40e   : > { %2556 = vpow2.f32 %v1932_v35 }
 0x415   : > { %v1898_v43 = vpop.xlane.xlu0 %1897 }
 0x416   : > { %v1916_v21 = vsub.f32 %v3890_v25, %v1898_v43 }
 0x417   : > { %v3967_v46 = vpop.eup %2554 }
 0x418   : > { %v1946_v14 = vmul.f32 1.442695, %v1916_v21  ;;  %v1968_v33 = vsel %vm1853_vm4, %v3967_v46, 0.0 }
 0x419   : > { %v1901_v32 = vpop.xlane.xlu1 %1900  ;;  %1969 = vadd.xlane.f32.xlu0 %v1968_v33  ;;  %v1868_v57 = vpop.xlane.xlu0 %1867 }
 0x41a   : > { %2558 = vpow2.f32 %v1946_v14  ;;  %v1906_v5 = vsub.f32 %v3874_v7, %v1868_v57  ;;  %v1917_v51 = vsub.f32 %v3896_v44, %v1901_v32 }
 0x41b   : > { %v3972_v11 = vpop.eup %2556 }
 0x41c   : > { %v1926_v54 = vmul.f32 1.442695, %v1906_v5  ;;  %v1971_v25 = vsel %vm1853_vm4, %v3972_v11, 0.0  ;;  %v1948_v52 = vmul.f32 1.442695, %v1917_v51 }
 0x41d   : > { %1972 = vadd.xlane.f32.xlu1 %v1971_v25  ;;  %v1871_v24 = vpop.xlane.xlu1 %1870  ;;  %v1892_v63 = vpop.xlane.xlu0 %1891 }
 0x41e   : > { %v1907_v10 = vsub.f32 %v3880_v48, %v1871_v24  ;;  %v1914_v42 = vsub.f32 %v3894_v61, %v1892_v63  ;;  %2560 = vpow2.f32 %v1926_v54  ;;  %v2344_v63 = vld [vmem:[%s4116_s6 + $0x20] sm:$0xff] }
 0x420   : > { %v1928_v1 = vmul.f32 1.442695, %v1907_v10  ;;  %v1942_v41 = vmul.f32 1.442695, %v1914_v42  ;;  %v2345_v10 = vld [vmem:[%s4116_s6 + $0x28] sm:$0xff] }
 0x421   : > { %v1895_v7 = vpop.xlane.xlu1 %1894  ;;  %v1862_v55 = vpop.xlane.xlu0 %1861  ;;  %v2152_v42 = vld [vmem:[%s4118_s8 + $0x8] sm:$0xff] }
 0x422   : > { %2562 = vpow2.f32 %v1928_v1  ;;  %v1904_v44 = vsub.f32 %v3862_v9, %v1862_v55  ;;  %v1915_v3 = vsub.f32 %v3912_v38, %v1895_v7 }
 0x423   : > { %2564 = vpow2.f32 %v1942_v41 }
 0x424   : > { %2566 = vpow2.f32 %v1948_v52  ;;  %v1922_v37 = vmul.f32 1.442695, %v1904_v44  ;;  %v1944_v22 = vmul.f32 1.442695, %v1915_v3  ;;  %v2151_v52 = vld [vmem:[%s4118_s8] sm:$0xff] }
 0x425   : > { %v1865_v27 = vpop.xlane.xlu1 %1864  ;;  %v1886_v23 = vpop.xlane.xlu0 %1885 }
 0x426   : > { %v1905_v48 = vsub.f32 %v3866_v36, %v1865_v27  ;;  %v1912_v61 = vsub.f32 %v3882_v16, %v1886_v23  ;;  %2568 = vpow2.f32 %v1922_v37 }
 0x427   : > { %v3983_v18 = vpop.eup %2558 }
 0x428   : > { %v1924_v13 = vmul.f32 1.442695, %v1905_v48  ;;  %v1938_v34 = vmul.f32 1.442695, %v1912_v61  ;;  %v1992_v9 = vsel %vm1853_vm4, %v3983_v18, 0.0 }
 0x429   : > { %v1889_v58 = vpop.xlane.xlu1 %1888  ;;  %1993 = vadd.xlane.f32.xlu0 %v1992_v9  ;;  %v1856_v38 = vpop.xlane.xlu0 %1855 }
 0x42a   : > { %2570 = vpow2.f32 %v1924_v13  ;;  %v1913_v28 = vsub.f32 %v3886_v56, %v1889_v58  ;;  %v1902_v12 = vsub.f32 %v3864_v31, %v1856_v38 }
 0x42b   : > { %2572 = vpow2.f32 %v1938_v34  ;;  %v3989_v36 = vpop.eup %2560 }
 0x42c   : > { %2574 = vpow2.f32 %v1944_v22  ;;  %v1940_v16 = vmul.f32 1.442695, %v1913_v28  ;;  %v1918_v2 = vmul.f32 1.442695, %v1902_v12  ;;  %v1962_v62 = vsel %vm1853_vm4, %v3989_v36, 0.0 }
 0x42d   : > { %v1859_v8 = vpop.xlane.xlu1 %1858  ;;  %v1880_v26 = vpop.xlane.xlu0 %1879  ;;  %1963 = vadd.xlane.f32.xlu0 %v1962_v62 }
 0x42e   : > { %v1903_v0 = vsub.f32 %v3868_v50, %v1859_v8  ;;  %v1910_v53 = vsub.f32 %v3884_v60, %v1880_v26  ;;  %2576 = vpow2.f32 %v1918_v2 }
 0x42f   : > { %v3995_v47 = vpop.eup %2562  ;;  %2578 = vpow2.f32 %v1940_v16 }
 0x430   : > { %v3997_v31 = vpop.eup %2564  ;;  %v1920_v56 = vmul.f32 1.442695, %v1903_v0  ;;  %v1934_v6 = vmul.f32 1.442695, %v1910_v53  ;;  %v1965_v15 = vsel %vm1853_vm4, %v3995_v47, 0.0 }
 0x431   : > { %v4001_v39 = vpop.eup %2566  ;;  %1966 = vadd.xlane.f32.xlu1 %v1965_v15  ;;  %v1883_v40 = vpop.xlane.xlu1 %1882  ;;  %v1986_v50 = vsel %vm1853_vm4, %v3997_v31, 0.0 }
 0x432   : > { %v1911_v60 = vsub.f32 %v3888_v45, %v1883_v40  ;;  %1987 = vadd.xlane.f32.xlu0 %v1986_v50  ;;  %2580 = vpow2.f32 %v1934_v6  ;;  %v1995_v20 = vsel %vm1853_vm4, %v4001_v39, 0.0 }
 0x433   : > { %v4006_v19 = vpop.eup %2568  ;;  %2582 = vpow2.f32 %v1920_v56 }
 0x434   : > { %v1936_v49 = vmul.f32 1.442695, %v1911_v60  ;;  %v1956_v4 = vsel %vm1853_vm4, %v4006_v19, 0.0 }
 0x435   : > { %1996 = vadd.xlane.f32.xlu1 %v1995_v20 }
 0x436   : > { %1957 = vadd.xlane.f32.xlu0 %v1956_v4  ;;  %2584 = vpow2.f32 %v1936_v49 }
 0x437   : > { %v4012_v29 = vpop.eup %2570 }
 0x438   : > { %v4014_v30 = vpop.eup %2572  ;;  %v1959_v45 = vsel %vm1853_vm4, %v4012_v29, 0.0 }
 0x439   : > { %v4018_v59 = vpop.eup %2574  ;;  %1960 = vadd.xlane.f32.xlu1 %v1959_v45  ;;  %v1980_v35 = vsel %vm1853_vm4, %v4014_v30, 0.0 }
 0x43a   : > { %1981 = vadd.xlane.f32.xlu0 %v1980_v35  ;;  %v1989_v21 = vsel %vm1853_vm4, %v4018_v59, 0.0 }
 0x43b   : > { %v4022_v43 = vpop.eup %2576 }
 0x43c   : > { %v4026_v14 = vpop.eup %2578  ;;  %v1950_v33 = vsel %vm1853_vm4, %v4022_v43, 0.0 }
 0x43d   : > { %1990 = vadd.xlane.f32.xlu1 %v1989_v21  ;;  %v1983_v57 = vsel %vm1853_vm4, %v4026_v14, 0.0 }
 0x43e   : > { %1951 = vadd.xlane.f32.xlu0 %v1950_v33 }
 0x43f   : > { %v4030_v32 = vpop.eup %2580 }
 0x440   : > { %v4034_v5 = vpop.eup %2582  ;;  %v1974_v51 = vsel %vm1853_vm4, %v4030_v32, 0.0 }
 0x441   : > { %1984 = vadd.xlane.f32.xlu1 %v1983_v57  ;;  %v1953_v54 = vsel %vm1853_vm4, %v4034_v5, 0.0 }
 0x442   : > { %1975 = vadd.xlane.f32.xlu0 %v1974_v51 }
 0x443   : > { %v4040_v25 = vpop.eup %2584 }
 0x444   : > { %v1977_v24 = vsel %vm1853_vm4, %v4040_v25, 0.0 }
 0x445   : > { %1954 = vadd.xlane.f32.xlu1 %v1953_v54 }
 0x449   : > { %1978 = vadd.xlane.f32.xlu1 %v1977_v24 }
 0x458   : > { %1588 = vperm.xlu0 %2500, %v2344_v63  }
 0x45a   : > { %1593 = vperm.xlu1 %2501, %v2345_v10  }
 0x45c   : > { %2160 = vperm.xlu0 %2500, %v2152_v42  }
 0x45e   : > { %2155 = vperm.xlu1 %2501, %v2151_v52  }
 0x47d   : > { %v4056_v1 = vpop.f32.mrf.mxu0 }
 0x47f   : > { %v2434_v41 = vpop.f32.mrf.mxu0 }
 0x481   : > { %v4058_v7 = vpop.f32.mrf.mxu0 }
 0x483   : > { %v2435_v55 = vpop.f32.mrf.mxu0 }
 0x4a2   : > { %v1970_v44 = vpop.xlane.xlu0 %1969 }
 0x4a3   : > { %2586 = vrcp.f32 %v1970_v44 }
 0x4a6   : > { %v1973_v3 = vpop.xlane.xlu1 %1972 }
 0x4a7   : > { %2588 = vrcp.f32 %v1973_v3 }
 0x4b0   : > { %v2587_v37 = vpop.eup %2586 }
 0x4b1   : > { %v2020_v48 = vmul.f32 %v2587_v37, %v3967_v46 }
 0x4b2   : > { %v1994_v27 = vpop.xlane.xlu0 %1993 }
 0x4b4   : > { %v2589_v23 = vpop.eup %2588 }
 0x4b5   : > { %v2021_v61 = vmul.f32 %v2589_v23, %v3972_v11 }
 0x4b6   : > { %v1964_v22 = vpop.xlane.xlu0 %1963 }
 0x4b7   : > { %v2033_v13 = vpack.c.bf16 %v2021_v61, %v2020_v48  ;;  %2590 = vrcp.f32 %v1964_v22 }
 0x4b9   : > { %v2051_v34 = vsel %vm1853_vm4, %v2033_v13, 0 }
 0x4ba   : > { %v1967_v9 = vpop.xlane.xlu1 %1966  ;;  %2457 = vmatpush3.bf16.xpose.msra.mxu1 %v2051_v34 }
 0x4bb   : > { %2592 = vrcp.f32 %v1967_v9  ;;  %v1988_v58 = vpop.xlane.xlu0 %1987  ;;  %2458 = vmatprep.subr.bf16.mxu1 %v2656_v17 }
 0x4bc   : > { %2594 = vrcp.f32 %v1994_v27 }
 0x4be   : > { %v1997_v38 = vpop.xlane.xlu1 %1996 }
 0x4bf   : > { %2596 = vrcp.f32 %v1997_v38  ;;  %v1958_v28 = vpop.xlane.xlu0 %1957 }
 0x4c0   : > { %2598 = vrcp.f32 %v1958_v28 }
 0x4c2   : > { %v1961_v12 = vpop.xlane.xlu1 %1960 }
 0x4c3   : > { %2600 = vrcp.f32 %v1961_v12  ;;  %v1982_v46 = vpop.xlane.xlu0 %1981 }
 0x4c4   : > { %2602 = vrcp.f32 %v1988_v58  ;;  %v2591_v11 = vpop.eup %2590 }
 0x4c5   : > { %v2018_v62 = vmul.f32 %v2591_v11, %v3989_v36 }
 0x4c6   : > { %v1991_v16 = vpop.xlane.xlu1 %1990 }
 0x4c7   : > { %2604 = vrcp.f32 %v1991_v16  ;;  %v1952_v8 = vpop.xlane.xlu0 %1951 }
 0x4c8   : > { %v2593_v2 = vpop.eup %2592  ;;  %2606 = vrcp.f32 %v1982_v46  ;;  %v2505_v46 = vld [vmem:[%s4117_s7] sm:$0xff]  }
 0x4c9   : > { %v2019_v26 = vmul.f32 %v2593_v2, %v3995_v47  ;;  %v2595_v0 = vpop.eup %2594 }
 0x4ca   : > { %v1985_v53 = vpop.xlane.xlu1 %1984  ;;  %v2028_v40 = vmul.f32 %v2595_v0, %v3983_v18 }
 0x4cb   : > { %2608 = vrcp.f32 %v1985_v53  ;;  %v2032_v56 = vpack.c.bf16 %v2019_v26, %v2018_v62  ;;  %v1976_v20 = vpop.xlane.xlu0 %1975 }
 0x4cc   : > { %v2597_v6 = vpop.eup %2596  ;;  %2610 = vrcp.f32 %v1952_v8 }
 0x4cd   : > { %v2048_v15 = vsel %vm1853_vm4, %v2032_v56, 0  ;;  %v2029_v50 = vmul.f32 %v2597_v6, %v4001_v39  ;;  %v2599_v60 = vpop.eup %2598 }
 0x4ce   : > { %v1955_v49 = vpop.xlane.xlu1 %1954  ;;  %2459 = vmatpush3.bf16.xpose.msra.mxu1 %v2048_v15  ;;  %v2016_v45 = vmul.f32 %v2599_v60, %v4006_v19 }
 0x4cf   : > { %2612 = vrcp.f32 %v1955_v49  ;;  %v2037_v36 = vpack.c.bf16 %v2029_v50, %v2028_v40  ;;  %2460 = vmatprep.subr.bf16.mxu1 %v2656_v17 }
 0x4d0   : > { %v2601_v47 = vpop.eup %2600  ;;  %2614 = vrcp.f32 %v1976_v20 }
 0x4d1   : > { %v2106_v4 = vsel %vm1853_vm4, %v2037_v36, 0  ;;  %v2017_v35 = vmul.f32 %v2601_v47, %v4012_v29  ;;  %v2603_v21 = vpop.eup %2602 }
 0x4d2   : > { %v1979_v18 = vpop.xlane.xlu1 %1978  ;;  %2469 = vmatpush3.bf16.xpose.msra.mxu0 %v2106_v4  ;;  %v2026_v51 = vmul.f32 %v2603_v21, %v3997_v31 }
 0x4d3   : > { %2616 = vrcp.f32 %v1979_v18  ;;  %v2031_v39 = vpack.c.bf16 %v2017_v35, %v2016_v45  ;;  %2470 = vmatprep.subr.bf16.mxu0 %v2656_v17  ;;  %v1589_v27 = vpop.permute.xlu0 %1588 }
 0x4d4   : > { %v2605_v33 = vpop.eup %2604 }
 0x4d5   : > { %v2045_v57 = vsel %vm1853_vm4, %v2031_v39, 0  ;;  %v2027_v54 = vmul.f32 %v2605_v33, %v4018_v59  ;;  %v2607_v24 = vpop.eup %2606 }
 0x4d6   : > { %2461 = vmatpush3.bf16.xpose.msra.mxu1 %v2045_v57  ;;  %v2024_v52 = vmul.f32 %v2607_v24, %v4014_v30  ;;  %v1651_v30 = vadd.f32 %v4056_v1, %v1589_v27  ;;  %v1594_v22 = vpop.permute.xlu1 %1593 }
 0x4d7   : > { %v2036_v19 = vpack.c.bf16 %v2027_v54, %v2026_v51  ;;  %2462 = vmatprep.subr.bf16.mxu1 %v2656_v17  ;;  %v2161_v62 = vpop.permute.xlu0 %2160 }
 0x4d8   : > { %v2609_v29 = vpop.eup %2608  ;;  %v1657_v61 = vpack.c.bf16 %v1651_v30, %v1651_v30 }
 0x4d9   : > { %v2103_v63 = vsel %vm1853_vm4, %v2036_v19, 0  ;;  %v2025_v10 = vmul.f32 %v2609_v29, %v4026_v14  ;;  %v2611_v42 = vpop.eup %2610 }
 0x4da   : > { %2471 = vmatpush3.bf16.xpose.msra.mxu0 %v2103_v63  ;;  %v2014_v31 = vmul.f32 %v2611_v42, %v4022_v43 }
 0x4db   : > { %2472 = vmatprep.subr.bf16.mxu0 %v2656_v17  ;;  %v2035_v55 = vpack.c.bf16 %v2025_v10, %v2024_v52 }
 0x4dc   : > { %v2613_v41 = vpop.eup %2612 }
 0x4dd   : > { %v2015_v59 = vmul.f32 %v2613_v41, %v4034_v5  ;;  %v2615_v44 = vpop.eup %2614  ;;  %v2100_v14 = vsel %vm1853_vm4, %v2035_v55, 0 }
 0x4de   : > { %v2022_v43 = vmul.f32 %v2615_v44, %v4030_v32 }
 0x4df   : > { %v2030_v3 = vpack.c.bf16 %v2015_v59, %v2014_v31 }
 0x4e0   : > { %v2617_v37 = vpop.eup %2616 }
 0x4e1   : > { %v2042_v23 = vsel %vm1853_vm4, %v2030_v3, 0  ;;  %v2023_v48 = vmul.f32 %v2617_v37, %v4040_v25  ;;  %v1654_v25 = vadd.f32 %v4058_v7, %v1594_v22  ;;  %v2156_v7 = vpop.permute.xlu1 %2155 }
 0x4e2   : > { %2463 = vmatpush3.bf16.xpose.msra.mxu1 %v2042_v23  ;;  %2473 = vmatpush3.bf16.xpose.msra.mxu0 %v2100_v14 }
 0x4e3   : > { %2474 = vmatprep.subr.bf16.mxu0 %v2656_v17  ;;  %2480 = vmatprep.subr.bf16.mxu1 %v2656_v17  ;;  %v2034_v5 = vpack.c.bf16 %v2023_v48, %v2022_v43  ;;  %v1658_v1 = vpack.c.bf16 %v1654_v25, %v1654_v25 }
 0x4e5   : > { %v2097_v13 = vsel %vm1853_vm4, %v2034_v5, 0 }
 0x4e9   : > { %2465 = vmatmul.mubr.msk.bf16.vlgmr.msra.gmra.mxu1 %vm1853_vm4, %v1657_v61 }
 0x4ea   : > { %2475 = vmatpush3.bf16.xpose.msra.mxu0 %v2097_v13  ;;  %2482 = vmatprep.mubr.msk.bf16.mxu1 %vm2657_vm1, %v2656_v17 }
 0x4f1   : > { %2477 = vmatmul.mubr.msk.bf16.vlgmr.msra.gmra.mxu0 %vm1853_vm4, %v1658_v1 }
 0x5a9   : > { %v2087_v32 = vpop.f32.mrf.mxu1 }
 0x5ab   : > { %v2466_v34 = vpop.f32.mrf.mxu1 }
 0x5ad   : > { %v2090_v9 = vpop.f32.mrf.mxu1 }
 0x5af   : > { %v2467_v58 = vpop.f32.mrf.mxu1 }
 0x5b1   : > { %v2142_v38 = vpop.f32.mrf.mxu0 }
 0x5b2   : > { %v2150_v28 = vpack.c.bf16 %v2142_v38, %v2087_v32 }
 0x5b3   : > { %v2478_v12 = vpop.f32.mrf.mxu0 }
 0x5b4   : > { %2481 = vmatpush3.bf16.msra.mxu1 %v2150_v28 }
 0x5b5   : > { %v2145_v11 = vpop.f32.mrf.mxu0 }
 0x5b7   : > { %v2479_v17 = vpop.f32.mrf.mxu0  ;;  %2483 = vmatmul.mubr.msk.bf16.vlgmr.msra.gmra.mxu1 %vm978_vm0, %v2505_v46 }
 0x677   : > { %v2205_v16 = vpop.f32.mrf.mxu1 }
 0x678   : > { %v2206_v2 = vadd.f32 %v2205_v16, %v2156_v7 }
 0x679   : > { %v2484_v8 = vpop.f32.mrf.mxu1 }
 0x67a   : > { %2212 = vst.msk [vmem:[%s332_s20] sm:$0xff] %vm1853_vm4, %v2206_v2 }
 0x67b   : > { %v2208_v26 = vpop.f32.mrf.mxu1 }
 0x67c   : > { %v2209_v0 = vadd.f32 %v2208_v26, %v2161_v62 }
 0x67d   : > { %v2485_v53 = vpop.f32.mrf.mxu1 }
 0x67e   : > { %2213 = vst.msk [vmem:[%s332_s20 + $0x8] sm:$0xff] %vm1853_vm4, %v2209_v0 }
 0x67f PF: > { %s19_s30 = sadd.s32 1, %s2654_s30  }
 0x680   : > { %p16_p4 = scmp.ge.s32.totalorder %s19_s30, 4  }
 0x682   :  { %18 = sbr.rel (!%p16_p4) target bundleno = 1 (0x1), region = 92 }

</bundles_post_ra>
